<compile_context>
chip_gen: v6e
topology: v6e:2x2x1
jax: 0.10.0
libtpu: 0.0.40
codegen_flags: <defaults>
</compile_context>

<pallas_src>
import math
from functools import partial

import jax
import jax.numpy as jnp
from jax.experimental import pallas as pl
from jax.experimental.pallas import tpu as pltpu


def _round_up(x, m):
    return ((x + m - 1) // m) * m


def _layer_norm(x, w, b, eps=1e-5):
    mu = jnp.mean(x, axis=-1, keepdims=True)
    xc = x - mu
    var = jnp.mean(xc * xc, axis=-1, keepdims=True)
    return xc * jax.lax.rsqrt(var + eps) * w + b


# ----------------------------- fused kernel ----------------------------------

def encoder_kernel(eos_ref,                               # scalar prefetch (SMEM)
                   x_ref, pos_ref, mask_ref,              # activations / constants
                   ln1w_ref, ln1b_ref, wqkv_ref, bqkv_ref, wo_ref, bo_ref,
                   ln2w_ref, ln2b_ref, wfc_ref, bfc_ref, wpr_ref, bpr_ref,
                   lnfw_ref, lnfb_ref, proj_ref,
                   out_ref,                               # [1, BB, P] per batch block
                   xs_ref,                                # VMEM scratch [BB*Lp, D] f32 carry
                   ctx_ref,                               # VMEM scratch [BB*Lp, D] bf16 ctx
                   *, num_heads, num_layers, block_batch, seq_len):
    bb = pl.program_id(0)
    l = pl.program_id(1)

    BB = block_batch
    Lp = seq_len
    D = xs_ref.shape[-1]
    H = num_heads
    dh = D // H
    scale = 1.0 / math.sqrt(dh)

    # Fused "x = prompts + positional_embedding" on the first layer step.
    @pl.when(l == 0)
    def _():
        pos = pos_ref[...].astype(jnp.float32)
        for bi in range(BB):
            xs_ref[pl.ds(bi * Lp, Lp), :] = x_ref[bi].astype(jnp.float32) + pos

    x = xs_ref[...]                                       # [BB*Lp, D] f32, VMEM-resident
    mask = mask_ref[...]                                  # additive causal [Lp, Lp] f32

    # -------- attention branch: x = x + out_proj(MHA(ln_1(x), causal)) --------
    h = _layer_norm(x, ln1w_ref[0, 0], ln1b_ref[0, 0])
    # Big slab QKV matmul (M = BB*Lp), f32 bias add, then ONE bf16 cast.
    qkv = (jnp.dot(h.astype(jnp.bfloat16), wqkv_ref[0],
                   preferred_element_type=jnp.float32)
           + bqkv_ref[0, 0]).astype(jnp.bfloat16)         # [BB*Lp, 3D] bf16

    # TODO(synk): if the MLIR dump shows lane-relayout copies for the dh-wide
    #             column slices below, pre-permute w_qkv columns on the host so
    #             per-head q/k/v slabs land on 128-lane boundaries.
    for bi in range(BB):                                  # per-sequence attention
        base = bi * Lp
        qkv_b = qkv[base:base + Lp, :]                    # [Lp, 3D] bf16
        k_t = qkv_b[:, D:2 * D].T                         # [D, Lp] one transpose / seq
        for hd in range(H):                               # static unroll over heads
            qh = qkv_b[:, hd * dh:(hd + 1) * dh]                     # [Lp, dh]
            kth = k_t[hd * dh:(hd + 1) * dh, :]                      # [dh, Lp]
            vh = qkv_b[:, 2 * D + hd * dh:2 * D + (hd + 1) * dh]     # [Lp, dh]
            s = jnp.dot(qh, kth, preferred_element_type=jnp.float32) * scale + mask
            s = s - jnp.max(s, axis=-1, keepdims=True)    # f32 softmax
            p = jnp.exp(s)
            p = p * pl.reciprocal(jnp.sum(p, axis=-1, keepdims=True), approx=True)
            o_h = jnp.dot(p.astype(jnp.bfloat16), vh,
                          preferred_element_type=jnp.float32)        # [Lp, dh]
            # Per-head context written at its lane offset; no per-head out_proj.
            ctx_ref[pl.ds(base, Lp), pl.ds(hd * dh, dh)] = o_h.astype(jnp.bfloat16)

    # Single K=D out_proj dot over the whole slab.
    attn = jnp.dot(ctx_ref[...], wo_ref[0],
                   preferred_element_type=jnp.float32) + bo_ref[0, 0]
    x = x + attn

    # -------- MLP branch: x = x + c_proj(QuickGELU(c_fc(ln_2(x)))) --------
    h2 = _layer_norm(x, ln2w_ref[0, 0], ln2b_ref[0, 0])
    fc = jnp.dot(h2.astype(jnp.bfloat16), wfc_ref[0],
                 preferred_element_type=jnp.float32) + bfc_ref[0, 0]
    fc = fc * jax.nn.sigmoid(1.702 * fc)                  # QuickGELU (f32, EUP)
    mlp = jnp.dot(fc.astype(jnp.bfloat16), wpr_ref[0],
                  preferred_element_type=jnp.float32) + bpr_ref[0, 0]
    x = x + mlp
    xs_ref[...] = x

    # -------- last layer: ln_final on the EOS row, then @ text_projection --------
    @pl.when(l == num_layers - 1)
    def _():
        for bi in range(BB):
            eos = eos_ref[bb * BB + bi]
            row = xs_ref[pl.ds(bi * Lp + eos, 1), :]      # [1, D] dynamic row gather
            hrow = _layer_norm(row, lnfw_ref[0], lnfb_ref[0])
            out_ref[0, pl.ds(bi, 1), :] = jnp.dot(
                hrow.astype(jnp.bfloat16), proj_ref[...],
                preferred_element_type=jnp.float32)


# ----------------------------- wrapper ----------------------------------------

def text_encoder_forward(prompts, eos_index, params, num_heads, block_batch=8):
    """Mirrors TextEncoder.forward(prompts, eos_index)."""
    B, L, D = prompts.shape
    P = params["text_projection"].shape[-1]
    NL = params["w_qkv"].shape[0]

    # Lane/sublane-friendly sequence padding (77 -> 128 for real CLIP); the
    # causal mask keeps padded keys out of every valid (q < L) query row, and
    # eos_index must be < L so padded rows never reach the output.
    Lp = _round_up(L, 8) if L <= 64 else _round_up(L, 128)

    # Batch blocking: BB sequences per grid step (amortizes per-layer weight DMA).
    BB = max(1, min(B, block_batch))
    # TODO(synk): on v7x keep ceil(B/BB) a multiple of 2 so the "parallel" batch
    #             axis feeds both TensorCores.
    B_pad = _round_up(B, BB)
    nb = B_pad // BB

    x = prompts.astype(jnp.bfloat16)                      # bf16 activation DMA
    pos = params["pos"][:L].astype(jnp.bfloat16)
    if Lp != L:
        x = jnp.pad(x, ((0, 0), (0, Lp - L), (0, 0)))
        pos = jnp.pad(pos, ((0, Lp - L), (0, 0)))
    if B_pad != B:
        x = jnp.pad(x, ((0, B_pad - B), (0, 0), (0, 0)))

    eos = eos_index.astype(jnp.int32)
    if B_pad != B:
        eos = jnp.pad(eos, (0, B_pad - B))

    # Additive causal mask, hoisted out of the kernel (loaded into VMEM once).
    rows = jnp.arange(Lp, dtype=jnp.int32)[:, None]
    cols = jnp.arange(Lp, dtype=jnp.int32)[None, :]
    mask = jnp.where(cols <= rows, 0.0, -1e30).astype(jnp.float32)

    weights = [params["ln1_w"], params["ln1_b"], params["w_qkv"], params["b_qkv"],
               params["w_o"], params["b_o"], params["ln2_w"], params["ln2_b"],
               params["w_fc"], params["b_fc"], params["w_pr"], params["b_pr"]]

    xmap = lambda bb, l, eos_ref: (bb, 0, 0)   # per-batch-block, resident across layers
    cmap2 = lambda bb, l, eos_ref: (0, 0)      # shared 2-D constants
    wmap3 = lambda bb, l, eos_ref: (l, 0, 0)   # stacked per-layer weights (prefetched)

    # TODO(synk): add pipeline_mode=pl.Buffered(3) on the weight BlockSpecs if
    #             xprof still shows exposed weight DMA at layer boundaries (v5e).
    in_specs = (
        [pl.BlockSpec((BB, Lp, D), xmap),
         pl.BlockSpec((Lp, D), cmap2),
         pl.BlockSpec((Lp, Lp), cmap2)]
        + [pl.BlockSpec((1,) + w.shape[1:], wmap3) for w in weights]
        + [pl.BlockSpec((1, D), cmap2),
           pl.BlockSpec((1, D), cmap2),
           pl.BlockSpec((D, P), cmap2)]
    )

    # VMEM budget: double-buffered per-layer weights + resident activations,
    # constants and the f32 qkv/fc matmul intermediates; clamp to 7/8 of the
    # physical VMEM of the actual chip (leaves headroom for Mosaic scratch).
    per_layer_w = sum(int(w.size) * w.dtype.itemsize for w in weights) // NL
    proj_bytes = int(params["text_projection"].size) * params["text_projection"].dtype.itemsize
    const_bytes = pos.size * 2 + mask.size * 4 + 2 * D * 4 + proj_bytes
    act_bytes = BB * Lp * D * (4 + 2) + 2 * BB * Lp * D * 2     # xs f32 + ctx bf16 + 2x input buf
    interm_bytes = BB * Lp * (3 * D + 4 * D) * (4 + 2) + BB * Lp * Lp * 4
    estimate = (2 * per_layer_w + 2 * const_bytes + act_bytes + interm_bytes
                + 2 * BB * P * 4 + (4 << 20))
    try:
        phys_vmem = int(getattr(pltpu.get_tpu_info(), "vmem_capacity_bytes", 64 * 2**20))
    except Exception:
        phys_vmem = 64 * 2**20
    vmem_limit = int(min((phys_vmem * 7) // 8, max(32 * 2**20, estimate)))

    out = pl.pallas_call(
        partial(encoder_kernel, num_heads=num_heads, num_layers=NL,
                block_batch=BB, seq_len=Lp),
        out_shape=jax.ShapeDtypeStruct((nb, BB, P), jnp.float32),
        grid_spec=pltpu.PrefetchScalarGridSpec(
            num_scalar_prefetch=1,
            grid=(nb, NL),
            in_specs=in_specs,
            out_specs=pl.BlockSpec((1, BB, P), xmap),
            scratch_shapes=[pltpu.VMEM((BB * Lp, D), jnp.float32),
                            pltpu.VMEM((BB * Lp, D), jnp.bfloat16)]),
        compiler_params=pltpu.CompilerParams(
            dimension_semantics=("parallel", "arbitrary"),
            vmem_limit_bytes=vmem_limit),
    )(eos, x, pos, mask, *weights,
      params["lnf_w"], params["lnf_b"], params["text_projection"])

    return out.reshape(B_pad, P)[:B].astype(jnp.float16)  # module's self.dtype


# ----------------------------- parameter setup --------------------------------

def init_params(key, D, n_layers, P, context_len=77):
    kq, ko, kf, kp, kpos, kproj = jax.random.split(key, 6)
    scale = 0.02

    def nrm(k, shape):
        return scale * jax.random.normal(k, shape, jnp.float32)

    # matmul weights stored (in_features, out_features) == PyTorch W.T, bf16;
    # LayerNorm params / biases stay f32 (elementwise math runs in f32).
    return {
        "pos": nrm(kpos, (context_len, D)),               # positional_embedding
        "lnf_w": jnp.ones((1, D), jnp.float32),           # ln_final
        "lnf_b": jnp.zeros((1, D), jnp.float32),
        "text_projection": nrm(kproj, (D, P)).astype(jnp.bfloat16),
        # stacked per-layer weights (leading axis = layer)
        "ln1_w": jnp.ones((n_layers, 1, D), jnp.float32),
        "ln1_b": jnp.zeros((n_layers, 1, D), jnp.float32),
        "w_qkv": nrm(kq, (n_layers, D, 3 * D)).astype(jnp.bfloat16),
        "b_qkv": jnp.zeros((n_layers, 1, 3 * D), jnp.float32),
        "w_o":   nrm(ko, (n_layers, D, D)).astype(jnp.bfloat16),
        "b_o":   jnp.zeros((n_layers, 1, D), jnp.float32),
        "ln2_w": jnp.ones((n_layers, 1, D), jnp.float32),
        "ln2_b": jnp.zeros((n_layers, 1, D), jnp.float32),
        "w_fc":  nrm(kf, (n_layers, D, 4 * D)).astype(jnp.bfloat16),
        "b_fc":  jnp.zeros((n_layers, 1, 4 * D), jnp.float32),
        "w_pr":  nrm(kp, (n_layers, 4 * D, D)).astype(jnp.bfloat16),
        "b_pr":  jnp.zeros((n_layers, 1, D), jnp.float32),
    }


# ----------------------------- main --------------------------------------------

if __name__ == "__main__":
    B, L, D, HEADS, LAYERS, P = 2, 8, 32, 4, 2, 32

    key = jax.random.PRNGKey(0)
    kparam, kx = jax.random.split(key)
    params = init_params(kparam, D, LAYERS, P)

    prompts = jax.random.normal(kx, (B, L, D), jnp.float32)    # "prompts" input
    eos_index = jnp.array([L - 1, L // 2], dtype=jnp.int32)    # per-batch EOS pos

    out = text_encoder_forward(prompts, eos_index, params, HEADS)
    out = jax.block_until_ready(out)

    assert out.shape == (B, P), out.shape
    assert out.dtype == jnp.float16, out.dtype
    assert bool(jnp.all(jnp.isfinite(out.astype(jnp.float32))))
    print("KERNEL_OK")
</pallas_src>

<mosaic_0001>
module attributes {stable_mosaic.version = 11 : i64} {
  func.func @encoder_kernel(%arg0: i32, %arg1: i32, %arg2: memref<2xi32, #tpu.memory_space<smem>>, %arg3: memref<2x8x32xbf16, #tpu.memory_space<vmem>>, %arg4: memref<8x32xbf16, #tpu.memory_space<vmem>>, %arg5: memref<8x8xf32, #tpu.memory_space<vmem>>, %arg6: memref<1x1x32xf32, #tpu.memory_space<vmem>>, %arg7: memref<1x1x32xf32, #tpu.memory_space<vmem>>, %arg8: memref<1x32x96xbf16, #tpu.memory_space<vmem>>, %arg9: memref<1x1x96xf32, #tpu.memory_space<vmem>>, %arg10: memref<1x32x32xbf16, #tpu.memory_space<vmem>>, %arg11: memref<1x1x32xf32, #tpu.memory_space<vmem>>, %arg12: memref<1x1x32xf32, #tpu.memory_space<vmem>>, %arg13: memref<1x1x32xf32, #tpu.memory_space<vmem>>, %arg14: memref<1x32x128xbf16, #tpu.memory_space<vmem>>, %arg15: memref<1x1x128xf32, #tpu.memory_space<vmem>>, %arg16: memref<1x128x32xbf16, #tpu.memory_space<vmem>>, %arg17: memref<1x1x32xf32, #tpu.memory_space<vmem>>, %arg18: memref<1x32xf32, #tpu.memory_space<vmem>>, %arg19: memref<1x32xf32, #tpu.memory_space<vmem>>, %arg20: memref<32x32xbf16, #tpu.memory_space<vmem>>, %arg21: memref<1x2x32xf32, #tpu.memory_space<vmem>>, %arg22: memref<16x32xf32, #tpu.memory_space<vmem>>, %arg23: memref<16x32xbf16, #tpu.memory_space<vmem>>) attributes {dimension_semantics = [#tpu.dimension_semantics<parallel>, #tpu.dimension_semantics<arbitrary>], iteration_bounds = array<i64: 1, 2>, scalar_prefetch = 1 : i64, scratch_operands = 2 : i64, tpu.core_type = #tpu.core_type<tc>, window_params = [{transform_indices = @transform_0, window_bounds = array<i64: 2, 8, 32>}, {pipeline_mode = #tpu.pipeline_mode<synchronous>, transform_indices = @transform_1, window_bounds = array<i64: 8, 32>}, {pipeline_mode = #tpu.pipeline_mode<synchronous>, transform_indices = @transform_2, window_bounds = array<i64: 8, 8>}, {transform_indices = @transform_3, window_bounds = array<i64: 1, 1, 32>}, {transform_indices = @transform_4, window_bounds = array<i64: 1, 1, 32>}, {transform_indices = @transform_5, window_bounds = array<i64: 1, 32, 96>}, {transform_indices = @transform_6, window_bounds = array<i64: 1, 1, 96>}, {transform_indices = @transform_7, window_bounds = array<i64: 1, 32, 32>}, {transform_indices = @transform_8, window_bounds = array<i64: 1, 1, 32>}, {transform_indices = @transform_9, window_bounds = array<i64: 1, 1, 32>}, {transform_indices = @transform_10, window_bounds = array<i64: 1, 1, 32>}, {transform_indices = @transform_11, window_bounds = array<i64: 1, 32, 128>}, {transform_indices = @transform_12, window_bounds = array<i64: 1, 1, 128>}, {transform_indices = @transform_13, window_bounds = array<i64: 1, 128, 32>}, {transform_indices = @transform_14, window_bounds = array<i64: 1, 1, 32>}, {pipeline_mode = #tpu.pipeline_mode<synchronous>, transform_indices = @transform_15, window_bounds = array<i64: 1, 32>}, {pipeline_mode = #tpu.pipeline_mode<synchronous>, transform_indices = @transform_16, window_bounds = array<i64: 1, 32>}, {pipeline_mode = #tpu.pipeline_mode<synchronous>, transform_indices = @transform_17, window_bounds = array<i64: 32, 32>}, {transform_indices = @transform_18, window_bounds = array<i64: 1, 2, 32>}]} {
    %c0_i32 = arith.constant 0 : i32
    %0 = arith.cmpi eq, %arg1, %c0_i32 : i32
    %1 = arith.extui %0 : i1 to i32
    %c0_i32_0 = arith.constant 0 : i32
    %2 = arith.cmpi ne, %1, %c0_i32_0 : i32
    scf.if %2 {
      %c0_113 = arith.constant 0 : index
      %c0_114 = arith.constant 0 : index
      %282 = vector.load %arg4[%c0_113, %c0_114] : memref<8x32xbf16, #tpu.memory_space<vmem>>, vector<8x32xbf16>
      %283 = arith.extf %282 : vector<8x32xbf16> to vector<8x32xf32>
      %c0_115 = arith.constant 0 : index
      %c0_116 = arith.constant 0 : index
      %c0_117 = arith.constant 0 : index
      %284 = vector.load %arg3[%c0_115, %c0_116, %c0_117] : memref<2x8x32xbf16, #tpu.memory_space<vmem>>, vector<1x8x32xbf16>
      %285 = vector.shape_cast %284 : vector<1x8x32xbf16> to vector<8x32xbf16>
      %286 = arith.extf %285 : vector<8x32xbf16> to vector<8x32xf32>
      %287 = arith.addf %286, %283 : vector<8x32xf32>
      %c0_118 = arith.constant 0 : index
      %c0_119 = arith.constant 0 : index
      %288 = vector.load %arg22[%c0_118, %c0_119] : memref<16x32xf32, #tpu.memory_space<vmem>>, vector<8x32xf32>
      tpu.vector_store %arg22[%c0_118, %c0_119], %287 {strides = array<i32>} : memref<16x32xf32, #tpu.memory_space<vmem>>, vector<8x32xf32>,
      %c1 = arith.constant 1 : index
      %c0_120 = arith.constant 0 : index
      %c0_121 = arith.constant 0 : index
      %289 = vector.load %arg3[%c1, %c0_120, %c0_121] : memref<2x8x32xbf16, #tpu.memory_space<vmem>>, vector<1x8x32xbf16>
      %290 = vector.shape_cast %289 : vector<1x8x32xbf16> to vector<8x32xbf16>
      %291 = arith.extf %290 : vector<8x32xbf16> to vector<8x32xf32>
      %292 = arith.addf %291, %283 : vector<8x32xf32>
      %c8_122 = arith.constant 8 : index
      %c0_123 = arith.constant 0 : index
      %293 = vector.load %arg22[%c8_122, %c0_123] : memref<16x32xf32, #tpu.memory_space<vmem>>, vector<8x32xf32>
      tpu.vector_store %arg22[%c8_122, %c0_123], %292 {strides = array<i32>} : memref<16x32xf32, #tpu.memory_space<vmem>>, vector<8x32xf32>,
    } else {
    }
    %c0 = arith.constant 0 : index
    %c0_1 = arith.constant 0 : index
    %3 = vector.load %arg22[%c0, %c0_1] : memref<16x32xf32, #tpu.memory_space<vmem>>, vector<16x32xf32>
    %c0_2 = arith.constant 0 : index
    %c0_3 = arith.constant 0 : index
    %4 = vector.load %arg5[%c0_2, %c0_3] : memref<8x8xf32, #tpu.memory_space<vmem>>, vector<8x8xf32>
    %c0_4 = arith.constant 0 : index
    %c0_5 = arith.constant 0 : index
    %c0_6 = arith.constant 0 : index
    %5 = vector.load %arg6[%c0_4, %c0_5, %c0_6] : memref<1x1x32xf32, #tpu.memory_space<vmem>>, vector<1x1x32xf32>
    %6 = vector.shape_cast %5 : vector<1x1x32xf32> to vector<32xf32>
    %c0_7 = arith.constant 0 : index
    %c0_8 = arith.constant 0 : index
    %c0_9 = arith.constant 0 : index
    %7 = vector.load %arg7[%c0_7, %c0_8, %c0_9] : memref<1x1x32xf32, #tpu.memory_space<vmem>>, vector<1x1x32xf32>
    %8 = vector.shape_cast %7 : vector<1x1x32xf32> to vector<32xf32>
    %cst = arith.constant dense<0.000000e+00> : vector<16xf32>
    %9 = vector.multi_reduction <add>, %3, %cst [1] : vector<16x32xf32> to vector<16xf32>
    %10 = vector.shape_cast %9 : vector<16xf32> to vector<16x1xf32>
    %cst_10 = arith.constant 3.200000e+01 : f32
    %11 = vector.broadcast %cst_10 : f32 to vector<16x1xf32>
    %12 = arith.divf %10, %11 : vector<16x1xf32>
    %13 = vector.broadcast %12 : vector<16x1xf32> to vector<16x32xf32>
    %14 = arith.subf %3, %13 : vector<16x32xf32>
    %15 = arith.mulf %14, %14 : vector<16x32xf32>
    %cst_11 = arith.constant dense<0.000000e+00> : vector<16xf32>
    %16 = vector.multi_reduction <add>, %15, %cst_11 [1] : vector<16x32xf32> to vector<16xf32>
    %17 = vector.shape_cast %16 : vector<16xf32> to vector<16x1xf32>
    %cst_12 = arith.constant 3.200000e+01 : f32
    %18 = vector.broadcast %cst_12 : f32 to vector<16x1xf32>
    %19 = arith.divf %17, %18 : vector<16x1xf32>
    %cst_13 = arith.constant 9.99999974E-6 : f32
    %20 = vector.broadcast %cst_13 : f32 to vector<16x1xf32>
    %21 = arith.addf %19, %20 : vector<16x1xf32>
    %22 = math.rsqrt %21 : vector<16x1xf32>
    %23 = vector.broadcast %22 : vector<16x1xf32> to vector<16x32xf32>
    %24 = arith.mulf %14, %23 : vector<16x32xf32>
    %25 = vector.shape_cast %6 : vector<32xf32> to vector<1x32xf32>
    %26 = vector.broadcast %25 : vector<1x32xf32> to vector<16x32xf32>
    %27 = arith.mulf %24, %26 : vector<16x32xf32>
    %28 = vector.shape_cast %8 : vector<32xf32> to vector<1x32xf32>
    %29 = vector.broadcast %28 : vector<1x32xf32> to vector<16x32xf32>
    %30 = arith.addf %27, %29 : vector<16x32xf32>
    %31 = arith.truncf %30 : vector<16x32xf32> to vector<16x32xbf16>
    %c0_14 = arith.constant 0 : index
    %c0_15 = arith.constant 0 : index
    %c0_16 = arith.constant 0 : index
    %32 = vector.load %arg8[%c0_14, %c0_15, %c0_16] : memref<1x32x96xbf16, #tpu.memory_space<vmem>>, vector<1x32x96xbf16>
    %33 = vector.shape_cast %32 : vector<1x32x96xbf16> to vector<32x96xbf16>
    %cst_17 = arith.constant dense<0.000000e+00> : vector<16x96xf32>
    %34 = tpu.matmul %31, %33, %cst_17 {dimension_numbers = #tpu.dot_dimension_numbers<[1], [0], [0], [1], [0, 0, 1, 1], [], []>} : vector<16x32xbf16>, vector<32x96xbf16>, vector<16x96xf32> -> vector<16x96xf32>
    %c0_18 = arith.constant 0 : index
    %c0_19 = arith.constant 0 : index
    %c0_20 = arith.constant 0 : index
    %35 = vector.load %arg9[%c0_18, %c0_19, %c0_20] : memref<1x1x96xf32, #tpu.memory_space<vmem>>, vector<1x1x96xf32>
    %36 = vector.shape_cast %35 : vector<1x1x96xf32> to vector<96xf32>
    %37 = vector.shape_cast %36 : vector<96xf32> to vector<1x96xf32>
    %38 = vector.broadcast %37 : vector<1x96xf32> to vector<16x96xf32>
    %39 = arith.addf %34, %38 : vector<16x96xf32>
    %40 = arith.truncf %39 : vector<16x96xf32> to vector<16x96xbf16>
    %41 = vector.extract_strided_slice %40 {offsets = [0, 0], sizes = [8, 96], strides = [1, 1]} : vector<16x96xbf16> to vector<8x96xbf16>
    %42 = vector.extract_strided_slice %41 {offsets = [0, 32], sizes = [8, 32], strides = [1, 1]} : vector<8x96xbf16> to vector<8x32xbf16>
    %43 = tpu.transpose %42, [1, 0] : vector<8x32xbf16> -> vector<32x8xbf16>
    %44 = vector.extract_strided_slice %41 {offsets = [0, 0], sizes = [8, 8], strides = [1, 1]} : vector<8x96xbf16> to vector<8x8xbf16>
    %45 = vector.extract_strided_slice %43 {offsets = [0, 0], sizes = [8, 8], strides = [1, 1]} : vector<32x8xbf16> to vector<8x8xbf16>
    %46 = vector.extract_strided_slice %41 {offsets = [0, 64], sizes = [8, 8], strides = [1, 1]} : vector<8x96xbf16> to vector<8x8xbf16>
    %cst_21 = arith.constant dense<0.000000e+00> : vector<8x8xf32>
    %47 = tpu.matmul %44, %45, %cst_21 {dimension_numbers = #tpu.dot_dimension_numbers<[1], [0], [0], [1], [0, 0, 1, 1], [], []>} : vector<8x8xbf16>, vector<8x8xbf16>, vector<8x8xf32> -> vector<8x8xf32>
    %cst_22 = arith.constant 0.353553385 : f32
    %48 = vector.broadcast %cst_22 : f32 to vector<8x8xf32>
    %49 = arith.mulf %47, %48 : vector<8x8xf32>
    %50 = arith.addf %49, %4 : vector<8x8xf32>
    %cst_23 = arith.constant dense<0xFF800000> : vector<8xf32>
    %51 = vector.multi_reduction <maximumf>, %50, %cst_23 [1] : vector<8x8xf32> to vector<8xf32>
    %52 = vector.shape_cast %51 : vector<8xf32> to vector<8x1xf32>
    %53 = vector.broadcast %52 : vector<8x1xf32> to vector<8x8xf32>
    %54 = arith.subf %50, %53 : vector<8x8xf32>
    %55 = math.exp %54 : vector<8x8xf32>
    %cst_24 = arith.constant dense<0.000000e+00> : vector<8xf32>
    %56 = vector.multi_reduction <add>, %55, %cst_24 [1] : vector<8x8xf32> to vector<8xf32>
    %57 = vector.shape_cast %56 : vector<8xf32> to vector<8x1xf32>
    %58 = tpu.reciprocal %57 {approx = true} : vector<8x1xf32> -> vector<8x1xf32>
    %59 = vector.broadcast %58 : vector<8x1xf32> to vector<8x8xf32>
    %60 = arith.mulf %55, %59 : vector<8x8xf32>
    %61 = arith.truncf %60 : vector<8x8xf32> to vector<8x8xbf16>
    %cst_25 = arith.constant dense<0.000000e+00> : vector<8x8xf32>
    %62 = tpu.matmul %61, %46, %cst_25 {dimension_numbers = #tpu.dot_dimension_numbers<[1], [0], [0], [1], [0, 0, 1, 1], [], []>} : vector<8x8xbf16>, vector<8x8xbf16>, vector<8x8xf32> -> vector<8x8xf32>
    %63 = arith.truncf %62 : vector<8x8xf32> to vector<8x8xbf16>
    %c0_26 = arith.constant 0 : index
    %c0_27 = arith.constant 0 : index
    %64 = vector.load %arg23[%c0_26, %c0_27] : memref<16x32xbf16, #tpu.memory_space<vmem>>, vector<8x8xbf16>
    tpu.vector_store %arg23[%c0_26, %c0_27], %63 {strides = array<i32>} : memref<16x32xbf16, #tpu.memory_space<vmem>>, vector<8x8xbf16>,
    %65 = vector.extract_strided_slice %41 {offsets = [0, 8], sizes = [8, 8], strides = [1, 1]} : vector<8x96xbf16> to vector<8x8xbf16>
    %66 = vector.extract_strided_slice %43 {offsets = [8, 0], sizes = [8, 8], strides = [1, 1]} : vector<32x8xbf16> to vector<8x8xbf16>
    %67 = vector.extract_strided_slice %41 {offsets = [0, 72], sizes = [8, 8], strides = [1, 1]} : vector<8x96xbf16> to vector<8x8xbf16>
    %cst_28 = arith.constant dense<0.000000e+00> : vector<8x8xf32>
    %68 = tpu.matmul %65, %66, %cst_28 {dimension_numbers = #tpu.dot_dimension_numbers<[1], [0], [0], [1], [0, 0, 1, 1], [], []>} : vector<8x8xbf16>, vector<8x8xbf16>, vector<8x8xf32> -> vector<8x8xf32>
    %cst_29 = arith.constant 0.353553385 : f32
    %69 = vector.broadcast %cst_29 : f32 to vector<8x8xf32>
    %70 = arith.mulf %68, %69 : vector<8x8xf32>
    %71 = arith.addf %70, %4 : vector<8x8xf32>
    %cst_30 = arith.constant dense<0xFF800000> : vector<8xf32>
    %72 = vector.multi_reduction <maximumf>, %71, %cst_30 [1] : vector<8x8xf32> to vector<8xf32>
    %73 = vector.shape_cast %72 : vector<8xf32> to vector<8x1xf32>
    %74 = vector.broadcast %73 : vector<8x1xf32> to vector<8x8xf32>
    %75 = arith.subf %71, %74 : vector<8x8xf32>
    %76 = math.exp %75 : vector<8x8xf32>
    %cst_31 = arith.constant dense<0.000000e+00> : vector<8xf32>
    %77 = vector.multi_reduction <add>, %76, %cst_31 [1] : vector<8x8xf32> to vector<8xf32>
    %78 = vector.shape_cast %77 : vector<8xf32> to vector<8x1xf32>
    %79 = tpu.reciprocal %78 {approx = true} : vector<8x1xf32> -> vector<8x1xf32>
    %80 = vector.broadcast %79 : vector<8x1xf32> to vector<8x8xf32>
    %81 = arith.mulf %76, %80 : vector<8x8xf32>
    %82 = arith.truncf %81 : vector<8x8xf32> to vector<8x8xbf16>
    %cst_32 = arith.constant dense<0.000000e+00> : vector<8x8xf32>
    %83 = tpu.matmul %82, %67, %cst_32 {dimension_numbers = #tpu.dot_dimension_numbers<[1], [0], [0], [1], [0, 0, 1, 1], [], []>} : vector<8x8xbf16>, vector<8x8xbf16>, vector<8x8xf32> -> vector<8x8xf32>
    %84 = arith.truncf %83 : vector<8x8xf32> to vector<8x8xbf16>
    %c0_33 = arith.constant 0 : index
    %c8 = arith.constant 8 : index
    %85 = vector.load %arg23[%c0_33, %c8] : memref<16x32xbf16, #tpu.memory_space<vmem>>, vector<8x8xbf16>
    tpu.vector_store %arg23[%c0_33, %c8], %84 {strides = array<i32>} : memref<16x32xbf16, #tpu.memory_space<vmem>>, vector<8x8xbf16>,
    %86 = vector.extract_strided_slice %41 {offsets = [0, 16], sizes = [8, 8], strides = [1, 1]} : vector<8x96xbf16> to vector<8x8xbf16>
    %87 = vector.extract_strided_slice %43 {offsets = [16, 0], sizes = [8, 8], strides = [1, 1]} : vector<32x8xbf16> to vector<8x8xbf16>
    %88 = vector.extract_strided_slice %41 {offsets = [0, 80], sizes = [8, 8], strides = [1, 1]} : vector<8x96xbf16> to vector<8x8xbf16>
    %cst_34 = arith.constant dense<0.000000e+00> : vector<8x8xf32>
    %89 = tpu.matmul %86, %87, %cst_34 {dimension_numbers = #tpu.dot_dimension_numbers<[1], [0], [0], [1], [0, 0, 1, 1], [], []>} : vector<8x8xbf16>, vector<8x8xbf16>, vector<8x8xf32> -> vector<8x8xf32>
    %cst_35 = arith.constant 0.353553385 : f32
    %90 = vector.broadcast %cst_35 : f32 to vector<8x8xf32>
    %91 = arith.mulf %89, %90 : vector<8x8xf32>
    %92 = arith.addf %91, %4 : vector<8x8xf32>
    %cst_36 = arith.constant dense<0xFF800000> : vector<8xf32>
    %93 = vector.multi_reduction <maximumf>, %92, %cst_36 [1] : vector<8x8xf32> to vector<8xf32>
    %94 = vector.shape_cast %93 : vector<8xf32> to vector<8x1xf32>
    %95 = vector.broadcast %94 : vector<8x1xf32> to vector<8x8xf32>
    %96 = arith.subf %92, %95 : vector<8x8xf32>
    %97 = math.exp %96 : vector<8x8xf32>
    %cst_37 = arith.constant dense<0.000000e+00> : vector<8xf32>
    %98 = vector.multi_reduction <add>, %97, %cst_37 [1] : vector<8x8xf32> to vector<8xf32>
    %99 = vector.shape_cast %98 : vector<8xf32> to vector<8x1xf32>
    %100 = tpu.reciprocal %99 {approx = true} : vector<8x1xf32> -> vector<8x1xf32>
    %101 = vector.broadcast %100 : vector<8x1xf32> to vector<8x8xf32>
    %102 = arith.mulf %97, %101 : vector<8x8xf32>
    %103 = arith.truncf %102 : vector<8x8xf32> to vector<8x8xbf16>
    %cst_38 = arith.constant dense<0.000000e+00> : vector<8x8xf32>
    %104 = tpu.matmul %103, %88, %cst_38 {dimension_numbers = #tpu.dot_dimension_numbers<[1], [0], [0], [1], [0, 0, 1, 1], [], []>} : vector<8x8xbf16>, vector<8x8xbf16>, vector<8x8xf32> -> vector<8x8xf32>
    %105 = arith.truncf %104 : vector<8x8xf32> to vector<8x8xbf16>
    %c0_39 = arith.constant 0 : index
    %c16 = arith.constant 16 : index
    %106 = vector.load %arg23[%c0_39, %c16] : memref<16x32xbf16, #tpu.memory_space<vmem>>, vector<8x8xbf16>
    tpu.vector_store %arg23[%c0_39, %c16], %105 {strides = array<i32>} : memref<16x32xbf16, #tpu.memory_space<vmem>>, vector<8x8xbf16>,
    %107 = vector.extract_strided_slice %41 {offsets = [0, 24], sizes = [8, 8], strides = [1, 1]} : vector<8x96xbf16> to vector<8x8xbf16>
    %108 = vector.extract_strided_slice %43 {offsets = [24, 0], sizes = [8, 8], strides = [1, 1]} : vector<32x8xbf16> to vector<8x8xbf16>
    %109 = vector.extract_strided_slice %41 {offsets = [0, 88], sizes = [8, 8], strides = [1, 1]} : vector<8x96xbf16> to vector<8x8xbf16>
    %cst_40 = arith.constant dense<0.000000e+00> : vector<8x8xf32>
    %110 = tpu.matmul %107, %108, %cst_40 {dimension_numbers = #tpu.dot_dimension_numbers<[1], [0], [0], [1], [0, 0, 1, 1], [], []>} : vector<8x8xbf16>, vector<8x8xbf16>, vector<8x8xf32> -> vector<8x8xf32>
    %cst_41 = arith.constant 0.353553385 : f32
    %111 = vector.broadcast %cst_41 : f32 to vector<8x8xf32>
    %112 = arith.mulf %110, %111 : vector<8x8xf32>
    %113 = arith.addf %112, %4 : vector<8x8xf32>
    %cst_42 = arith.constant dense<0xFF800000> : vector<8xf32>
    %114 = vector.multi_reduction <maximumf>, %113, %cst_42 [1] : vector<8x8xf32> to vector<8xf32>
    %115 = vector.shape_cast %114 : vector<8xf32> to vector<8x1xf32>
    %116 = vector.broadcast %115 : vector<8x1xf32> to vector<8x8xf32>
    %117 = arith.subf %113, %116 : vector<8x8xf32>
    %118 = math.exp %117 : vector<8x8xf32>
    %cst_43 = arith.constant dense<0.000000e+00> : vector<8xf32>
    %119 = vector.multi_reduction <add>, %118, %cst_43 [1] : vector<8x8xf32> to vector<8xf32>
    %120 = vector.shape_cast %119 : vector<8xf32> to vector<8x1xf32>
    %121 = tpu.reciprocal %120 {approx = true} : vector<8x1xf32> -> vector<8x1xf32>
    %122 = vector.broadcast %121 : vector<8x1xf32> to vector<8x8xf32>
    %123 = arith.mulf %118, %122 : vector<8x8xf32>
    %124 = arith.truncf %123 : vector<8x8xf32> to vector<8x8xbf16>
    %cst_44 = arith.constant dense<0.000000e+00> : vector<8x8xf32>
    %125 = tpu.matmul %124, %109, %cst_44 {dimension_numbers = #tpu.dot_dimension_numbers<[1], [0], [0], [1], [0, 0, 1, 1], [], []>} : vector<8x8xbf16>, vector<8x8xbf16>, vector<8x8xf32> -> vector<8x8xf32>
    %126 = arith.truncf %125 : vector<8x8xf32> to vector<8x8xbf16>
    %c0_45 = arith.constant 0 : index
    %c24 = arith.constant 24 : index
    %127 = vector.load %arg23[%c0_45, %c24] : memref<16x32xbf16, #tpu.memory_space<vmem>>, vector<8x8xbf16>
    tpu.vector_store %arg23[%c0_45, %c24], %126 {strides = array<i32>} : memref<16x32xbf16, #tpu.memory_space<vmem>>, vector<8x8xbf16>,
    %128 = vector.extract_strided_slice %40 {offsets = [8, 0], sizes = [8, 96], strides = [1, 1]} : vector<16x96xbf16> to vector<8x96xbf16>
    %129 = vector.extract_strided_slice %128 {offsets = [0, 32], sizes = [8, 32], strides = [1, 1]} : vector<8x96xbf16> to vector<8x32xbf16>
    %130 = tpu.transpose %129, [1, 0] : vector<8x32xbf16> -> vector<32x8xbf16>
    %131 = vector.extract_strided_slice %128 {offsets = [0, 0], sizes = [8, 8], strides = [1, 1]} : vector<8x96xbf16> to vector<8x8xbf16>
    %132 = vector.extract_strided_slice %130 {offsets = [0, 0], sizes = [8, 8], strides = [1, 1]} : vector<32x8xbf16> to vector<8x8xbf16>
    %133 = vector.extract_strided_slice %128 {offsets = [0, 64], sizes = [8, 8], strides = [1, 1]} : vector<8x96xbf16> to vector<8x8xbf16>
    %cst_46 = arith.constant dense<0.000000e+00> : vector<8x8xf32>
    %134 = tpu.matmul %131, %132, %cst_46 {dimension_numbers = #tpu.dot_dimension_numbers<[1], [0], [0], [1], [0, 0, 1, 1], [], []>} : vector<8x8xbf16>, vector<8x8xbf16>, vector<8x8xf32> -> vector<8x8xf32>
    %cst_47 = arith.constant 0.353553385 : f32
    %135 = vector.broadcast %cst_47 : f32 to vector<8x8xf32>
    %136 = arith.mulf %134, %135 : vector<8x8xf32>
    %137 = arith.addf %136, %4 : vector<8x8xf32>
    %cst_48 = arith.constant dense<0xFF800000> : vector<8xf32>
    %138 = vector.multi_reduction <maximumf>, %137, %cst_48 [1] : vector<8x8xf32> to vector<8xf32>
    %139 = vector.shape_cast %138 : vector<8xf32> to vector<8x1xf32>
    %140 = vector.broadcast %139 : vector<8x1xf32> to vector<8x8xf32>
    %141 = arith.subf %137, %140 : vector<8x8xf32>
    %142 = math.exp %141 : vector<8x8xf32>
    %cst_49 = arith.constant dense<0.000000e+00> : vector<8xf32>
    %143 = vector.multi_reduction <add>, %142, %cst_49 [1] : vector<8x8xf32> to vector<8xf32>
    %144 = vector.shape_cast %143 : vector<8xf32> to vector<8x1xf32>
    %145 = tpu.reciprocal %144 {approx = true} : vector<8x1xf32> -> vector<8x1xf32>
    %146 = vector.broadcast %145 : vector<8x1xf32> to vector<8x8xf32>
    %147 = arith.mulf %142, %146 : vector<8x8xf32>
    %148 = arith.truncf %147 : vector<8x8xf32> to vector<8x8xbf16>
    %cst_50 = arith.constant dense<0.000000e+00> : vector<8x8xf32>
    %149 = tpu.matmul %148, %133, %cst_50 {dimension_numbers = #tpu.dot_dimension_numbers<[1], [0], [0], [1], [0, 0, 1, 1], [], []>} : vector<8x8xbf16>, vector<8x8xbf16>, vector<8x8xf32> -> vector<8x8xf32>
    %150 = arith.truncf %149 : vector<8x8xf32> to vector<8x8xbf16>
    %c8_51 = arith.constant 8 : index
    %c0_52 = arith.constant 0 : index
    %151 = vector.load %arg23[%c8_51, %c0_52] : memref<16x32xbf16, #tpu.memory_space<vmem>>, vector<8x8xbf16>
    tpu.vector_store %arg23[%c8_51, %c0_52], %150 {strides = array<i32>} : memref<16x32xbf16, #tpu.memory_space<vmem>>, vector<8x8xbf16>,
    %152 = vector.extract_strided_slice %128 {offsets = [0, 8], sizes = [8, 8], strides = [1, 1]} : vector<8x96xbf16> to vector<8x8xbf16>
    %153 = vector.extract_strided_slice %130 {offsets = [8, 0], sizes = [8, 8], strides = [1, 1]} : vector<32x8xbf16> to vector<8x8xbf16>
    %154 = vector.extract_strided_slice %128 {offsets = [0, 72], sizes = [8, 8], strides = [1, 1]} : vector<8x96xbf16> to vector<8x8xbf16>
    %cst_53 = arith.constant dense<0.000000e+00> : vector<8x8xf32>
    %155 = tpu.matmul %152, %153, %cst_53 {dimension_numbers = #tpu.dot_dimension_numbers<[1], [0], [0], [1], [0, 0, 1, 1], [], []>} : vector<8x8xbf16>, vector<8x8xbf16>, vector<8x8xf32> -> vector<8x8xf32>
    %cst_54 = arith.constant 0.353553385 : f32
    %156 = vector.broadcast %cst_54 : f32 to vector<8x8xf32>
    %157 = arith.mulf %155, %156 : vector<8x8xf32>
    %158 = arith.addf %157, %4 : vector<8x8xf32>
    %cst_55 = arith.constant dense<0xFF800000> : vector<8xf32>
    %159 = vector.multi_reduction <maximumf>, %158, %cst_55 [1] : vector<8x8xf32> to vector<8xf32>
    %160 = vector.shape_cast %159 : vector<8xf32> to vector<8x1xf32>
    %161 = vector.broadcast %160 : vector<8x1xf32> to vector<8x8xf32>
    %162 = arith.subf %158, %161 : vector<8x8xf32>
    %163 = math.exp %162 : vector<8x8xf32>
    %cst_56 = arith.constant dense<0.000000e+00> : vector<8xf32>
    %164 = vector.multi_reduction <add>, %163, %cst_56 [1] : vector<8x8xf32> to vector<8xf32>
    %165 = vector.shape_cast %164 : vector<8xf32> to vector<8x1xf32>
    %166 = tpu.reciprocal %165 {approx = true} : vector<8x1xf32> -> vector<8x1xf32>
    %167 = vector.broadcast %166 : vector<8x1xf32> to vector<8x8xf32>
    %168 = arith.mulf %163, %167 : vector<8x8xf32>
    %169 = arith.truncf %168 : vector<8x8xf32> to vector<8x8xbf16>
    %cst_57 = arith.constant dense<0.000000e+00> : vector<8x8xf32>
    %170 = tpu.matmul %169, %154, %cst_57 {dimension_numbers = #tpu.dot_dimension_numbers<[1], [0], [0], [1], [0, 0, 1, 1], [], []>} : vector<8x8xbf16>, vector<8x8xbf16>, vector<8x8xf32> -> vector<8x8xf32>
    %171 = arith.truncf %170 : vector<8x8xf32> to vector<8x8xbf16>
    %c8_58 = arith.constant 8 : index
    %c8_59 = arith.constant 8 : index
    %172 = vector.load %arg23[%c8_58, %c8_59] : memref<16x32xbf16, #tpu.memory_space<vmem>>, vector<8x8xbf16>
    tpu.vector_store %arg23[%c8_58, %c8_59], %171 {strides = array<i32>} : memref<16x32xbf16, #tpu.memory_space<vmem>>, vector<8x8xbf16>,
    %173 = vector.extract_strided_slice %128 {offsets = [0, 16], sizes = [8, 8], strides = [1, 1]} : vector<8x96xbf16> to vector<8x8xbf16>
    %174 = vector.extract_strided_slice %130 {offsets = [16, 0], sizes = [8, 8], strides = [1, 1]} : vector<32x8xbf16> to vector<8x8xbf16>
    %175 = vector.extract_strided_slice %128 {offsets = [0, 80], sizes = [8, 8], strides = [1, 1]} : vector<8x96xbf16> to vector<8x8xbf16>
    %cst_60 = arith.constant dense<0.000000e+00> : vector<8x8xf32>
    %176 = tpu.matmul %173, %174, %cst_60 {dimension_numbers = #tpu.dot_dimension_numbers<[1], [0], [0], [1], [0, 0, 1, 1], [], []>} : vector<8x8xbf16>, vector<8x8xbf16>, vector<8x8xf32> -> vector<8x8xf32>
    %cst_61 = arith.constant 0.353553385 : f32
    %177 = vector.broadcast %cst_61 : f32 to vector<8x8xf32>
    %178 = arith.mulf %176, %177 : vector<8x8xf32>
    %179 = arith.addf %178, %4 : vector<8x8xf32>
    %cst_62 = arith.constant dense<0xFF800000> : vector<8xf32>
    %180 = vector.multi_reduction <maximumf>, %179, %cst_62 [1] : vector<8x8xf32> to vector<8xf32>
    %181 = vector.shape_cast %180 : vector<8xf32> to vector<8x1xf32>
    %182 = vector.broadcast %181 : vector<8x1xf32> to vector<8x8xf32>
    %183 = arith.subf %179, %182 : vector<8x8xf32>
    %184 = math.exp %183 : vector<8x8xf32>
    %cst_63 = arith.constant dense<0.000000e+00> : vector<8xf32>
    %185 = vector.multi_reduction <add>, %184, %cst_63 [1] : vector<8x8xf32> to vector<8xf32>
    %186 = vector.shape_cast %185 : vector<8xf32> to vector<8x1xf32>
    %187 = tpu.reciprocal %186 {approx = true} : vector<8x1xf32> -> vector<8x1xf32>
    %188 = vector.broadcast %187 : vector<8x1xf32> to vector<8x8xf32>
    %189 = arith.mulf %184, %188 : vector<8x8xf32>
    %190 = arith.truncf %189 : vector<8x8xf32> to vector<8x8xbf16>
    %cst_64 = arith.constant dense<0.000000e+00> : vector<8x8xf32>
    %191 = tpu.matmul %190, %175, %cst_64 {dimension_numbers = #tpu.dot_dimension_numbers<[1], [0], [0], [1], [0, 0, 1, 1], [], []>} : vector<8x8xbf16>, vector<8x8xbf16>, vector<8x8xf32> -> vector<8x8xf32>
    %192 = arith.truncf %191 : vector<8x8xf32> to vector<8x8xbf16>
    %c8_65 = arith.constant 8 : index
    %c16_66 = arith.constant 16 : index
    %193 = vector.load %arg23[%c8_65, %c16_66] : memref<16x32xbf16, #tpu.memory_space<vmem>>, vector<8x8xbf16>
    tpu.vector_store %arg23[%c8_65, %c16_66], %192 {strides = array<i32>} : memref<16x32xbf16, #tpu.memory_space<vmem>>, vector<8x8xbf16>,
    %194 = vector.extract_strided_slice %128 {offsets = [0, 24], sizes = [8, 8], strides = [1, 1]} : vector<8x96xbf16> to vector<8x8xbf16>
    %195 = vector.extract_strided_slice %130 {offsets = [24, 0], sizes = [8, 8], strides = [1, 1]} : vector<32x8xbf16> to vector<8x8xbf16>
    %196 = vector.extract_strided_slice %128 {offsets = [0, 88], sizes = [8, 8], strides = [1, 1]} : vector<8x96xbf16> to vector<8x8xbf16>
    %cst_67 = arith.constant dense<0.000000e+00> : vector<8x8xf32>
    %197 = tpu.matmul %194, %195, %cst_67 {dimension_numbers = #tpu.dot_dimension_numbers<[1], [0], [0], [1], [0, 0, 1, 1], [], []>} : vector<8x8xbf16>, vector<8x8xbf16>, vector<8x8xf32> -> vector<8x8xf32>
    %cst_68 = arith.constant 0.353553385 : f32
    %198 = vector.broadcast %cst_68 : f32 to vector<8x8xf32>
    %199 = arith.mulf %197, %198 : vector<8x8xf32>
    %200 = arith.addf %199, %4 : vector<8x8xf32>
    %cst_69 = arith.constant dense<0xFF800000> : vector<8xf32>
    %201 = vector.multi_reduction <maximumf>, %200, %cst_69 [1] : vector<8x8xf32> to vector<8xf32>
    %202 = vector.shape_cast %201 : vector<8xf32> to vector<8x1xf32>
    %203 = vector.broadcast %202 : vector<8x1xf32> to vector<8x8xf32>
    %204 = arith.subf %200, %203 : vector<8x8xf32>
    %205 = math.exp %204 : vector<8x8xf32>
    %cst_70 = arith.constant dense<0.000000e+00> : vector<8xf32>
    %206 = vector.multi_reduction <add>, %205, %cst_70 [1] : vector<8x8xf32> to vector<8xf32>
    %207 = vector.shape_cast %206 : vector<8xf32> to vector<8x1xf32>
    %208 = tpu.reciprocal %207 {approx = true} : vector<8x1xf32> -> vector<8x1xf32>
    %209 = vector.broadcast %208 : vector<8x1xf32> to vector<8x8xf32>
    %210 = arith.mulf %205, %209 : vector<8x8xf32>
    %211 = arith.truncf %210 : vector<8x8xf32> to vector<8x8xbf16>
    %cst_71 = arith.constant dense<0.000000e+00> : vector<8x8xf32>
    %212 = tpu.matmul %211, %196, %cst_71 {dimension_numbers = #tpu.dot_dimension_numbers<[1], [0], [0], [1], [0, 0, 1, 1], [], []>} : vector<8x8xbf16>, vector<8x8xbf16>, vector<8x8xf32> -> vector<8x8xf32>
    %213 = arith.truncf %212 : vector<8x8xf32> to vector<8x8xbf16>
    %c8_72 = arith.constant 8 : index
    %c24_73 = arith.constant 24 : index
    %214 = vector.load %arg23[%c8_72, %c24_73] : memref<16x32xbf16, #tpu.memory_space<vmem>>, vector<8x8xbf16>
    tpu.vector_store %arg23[%c8_72, %c24_73], %213 {strides = array<i32>} : memref<16x32xbf16, #tpu.memory_space<vmem>>, vector<8x8xbf16>,
    %c0_74 = arith.constant 0 : index
    %c0_75 = arith.constant 0 : index
    %215 = vector.load %arg23[%c0_74, %c0_75] : memref<16x32xbf16, #tpu.memory_space<vmem>>, vector<16x32xbf16>
    %c0_76 = arith.constant 0 : index
    %c0_77 = arith.constant 0 : index
    %c0_78 = arith.constant 0 : index
    %216 = vector.load %arg10[%c0_76, %c0_77, %c0_78] : memref<1x32x32xbf16, #tpu.memory_space<vmem>>, vector<1x32x32xbf16>
    %217 = vector.shape_cast %216 : vector<1x32x32xbf16> to vector<32x32xbf16>
    %cst_79 = arith.constant dense<0.000000e+00> : vector<16x32xf32>
    %218 = tpu.matmul %215, %217, %cst_79 {dimension_numbers = #tpu.dot_dimension_numbers<[1], [0], [0], [1], [0, 0, 1, 1], [], []>} : vector<16x32xbf16>, vector<32x32xbf16>, vector<16x32xf32> -> vector<16x32xf32>
    %c0_80 = arith.constant 0 : index
    %c0_81 = arith.constant 0 : index
    %c0_82 = arith.constant 0 : index
    %219 = vector.load %arg11[%c0_80, %c0_81, %c0_82] : memref<1x1x32xf32, #tpu.memory_space<vmem>>, vector<1x1x32xf32>
    %220 = vector.shape_cast %219 : vector<1x1x32xf32> to vector<32xf32>
    %221 = vector.shape_cast %220 : vector<32xf32> to vector<1x32xf32>
    %222 = vector.broadcast %221 : vector<1x32xf32> to vector<16x32xf32>
    %223 = arith.addf %218, %222 : vector<16x32xf32>
    %224 = arith.addf %3, %223 : vector<16x32xf32>
    %c0_83 = arith.constant 0 : index
    %c0_84 = arith.constant 0 : index
    %c0_85 = arith.constant 0 : index
    %225 = vector.load %arg12[%c0_83, %c0_84, %c0_85] : memref<1x1x32xf32, #tpu.memory_space<vmem>>, vector<1x1x32xf32>
    %226 = vector.shape_cast %225 : vector<1x1x32xf32> to vector<32xf32>
    %c0_86 = arith.constant 0 : index
    %c0_87 = arith.constant 0 : index
    %c0_88 = arith.constant 0 : index
    %227 = vector.load %arg13[%c0_86, %c0_87, %c0_88] : memref<1x1x32xf32, #tpu.memory_space<vmem>>, vector<1x1x32xf32>
    %228 = vector.shape_cast %227 : vector<1x1x32xf32> to vector<32xf32>
    %cst_89 = arith.constant dense<0.000000e+00> : vector<16xf32>
    %229 = vector.multi_reduction <add>, %224, %cst_89 [1] : vector<16x32xf32> to vector<16xf32>
    %230 = vector.shape_cast %229 : vector<16xf32> to vector<16x1xf32>
    %cst_90 = arith.constant 3.200000e+01 : f32
    %231 = vector.broadcast %cst_90 : f32 to vector<16x1xf32>
    %232 = arith.divf %230, %231 : vector<16x1xf32>
    %233 = vector.broadcast %232 : vector<16x1xf32> to vector<16x32xf32>
    %234 = arith.subf %224, %233 : vector<16x32xf32>
    %235 = arith.mulf %234, %234 : vector<16x32xf32>
    %cst_91 = arith.constant dense<0.000000e+00> : vector<16xf32>
    %236 = vector.multi_reduction <add>, %235, %cst_91 [1] : vector<16x32xf32> to vector<16xf32>
    %237 = vector.shape_cast %236 : vector<16xf32> to vector<16x1xf32>
    %cst_92 = arith.constant 3.200000e+01 : f32
    %238 = vector.broadcast %cst_92 : f32 to vector<16x1xf32>
    %239 = arith.divf %237, %238 : vector<16x1xf32>
    %cst_93 = arith.constant 9.99999974E-6 : f32
    %240 = vector.broadcast %cst_93 : f32 to vector<16x1xf32>
    %241 = arith.addf %239, %240 : vector<16x1xf32>
    %242 = math.rsqrt %241 : vector<16x1xf32>
    %243 = vector.broadcast %242 : vector<16x1xf32> to vector<16x32xf32>
    %244 = arith.mulf %234, %243 : vector<16x32xf32>
    %245 = vector.shape_cast %226 : vector<32xf32> to vector<1x32xf32>
    %246 = vector.broadcast %245 : vector<1x32xf32> to vector<16x32xf32>
    %247 = arith.mulf %244, %246 : vector<16x32xf32>
    %248 = vector.shape_cast %228 : vector<32xf32> to vector<1x32xf32>
    %249 = vector.broadcast %248 : vector<1x32xf32> to vector<16x32xf32>
    %250 = arith.addf %247, %249 : vector<16x32xf32>
    %251 = arith.truncf %250 : vector<16x32xf32> to vector<16x32xbf16>
    %c0_94 = arith.constant 0 : index
    %c0_95 = arith.constant 0 : index
    %c0_96 = arith.constant 0 : index
    %252 = vector.load %arg14[%c0_94, %c0_95, %c0_96] : memref<1x32x128xbf16, #tpu.memory_space<vmem>>, vector<1x32x128xbf16>
    %253 = vector.shape_cast %252 : vector<1x32x128xbf16> to vector<32x128xbf16>
    %cst_97 = arith.constant dense<0.000000e+00> : vector<16x128xf32>
    %254 = tpu.matmul %251, %253, %cst_97 {dimension_numbers = #tpu.dot_dimension_numbers<[1], [0], [0], [1], [0, 0, 1, 1], [], []>} : vector<16x32xbf16>, vector<32x128xbf16>, vector<16x128xf32> -> vector<16x128xf32>
    %c0_98 = arith.constant 0 : index
    %c0_99 = arith.constant 0 : index
    %c0_100 = arith.constant 0 : index
    %255 = vector.load %arg15[%c0_98, %c0_99, %c0_100] : memref<1x1x128xf32, #tpu.memory_space<vmem>>, vector<1x1x128xf32>
    %256 = vector.shape_cast %255 : vector<1x1x128xf32> to vector<128xf32>
    %257 = vector.shape_cast %256 : vector<128xf32> to vector<1x128xf32>
    %258 = vector.broadcast %257 : vector<1x128xf32> to vector<16x128xf32>
    %259 = arith.addf %254, %258 : vector<16x128xf32>
    %cst_101 = arith.constant 1.702000e+00 : f32
    %260 = vector.broadcast %cst_101 : f32 to vector<16x128xf32>
    %261 = arith.mulf %260, %259 : vector<16x128xf32>
    %262 = arith.negf %261 : vector<16x128xf32>
    %263 = math.exp %262 : vector<16x128xf32>
    %cst_102 = arith.constant 1.000000e+00 : f32
    %264 = vector.broadcast %cst_102 : f32 to vector<16x128xf32>
    %265 = arith.addf %264, %263 : vector<16x128xf32>
    %266 = arith.divf %264, %265 : vector<16x128xf32>
    %267 = arith.mulf %259, %266 : vector<16x128xf32>
    %268 = arith.truncf %267 : vector<16x128xf32> to vector<16x128xbf16>
    %c0_103 = arith.constant 0 : index
    %c0_104 = arith.constant 0 : index
    %c0_105 = arith.constant 0 : index
    %269 = vector.load %arg16[%c0_103, %c0_104, %c0_105] : memref<1x128x32xbf16, #tpu.memory_space<vmem>>, vector<1x128x32xbf16>
    %270 = vector.shape_cast %269 : vector<1x128x32xbf16> to vector<128x32xbf16>
    %cst_106 = arith.constant dense<0.000000e+00> : vector<16x32xf32>
    %271 = tpu.matmul %268, %270, %cst_106 {dimension_numbers = #tpu.dot_dimension_numbers<[1], [0], [0], [1], [0, 0, 1, 1], [], []>} : vector<16x128xbf16>, vector<128x32xbf16>, vector<16x32xf32> -> vector<16x32xf32>
    %c0_107 = arith.constant 0 : index
    %c0_108 = arith.constant 0 : index
    %c0_109 = arith.constant 0 : index
    %272 = vector.load %arg17[%c0_107, %c0_108, %c0_109] : memref<1x1x32xf32, #tpu.memory_space<vmem>>, vector<1x1x32xf32>
    %273 = vector.shape_cast %272 : vector<1x1x32xf32> to vector<32xf32>
    %274 = vector.shape_cast %273 : vector<32xf32> to vector<1x32xf32>
    %275 = vector.broadcast %274 : vector<1x32xf32> to vector<16x32xf32>
    %276 = arith.addf %271, %275 : vector<16x32xf32>
    %277 = arith.addf %224, %276 : vector<16x32xf32>
    %c0_110 = arith.constant 0 : index
    %c0_111 = arith.constant 0 : index
    %278 = vector.load %arg22[%c0_110, %c0_111] : memref<16x32xf32, #tpu.memory_space<vmem>>, vector<16x32xf32>
    tpu.vector_store %arg22[%c0_110, %c0_111], %277 {strides = array<i32>} : memref<16x32xf32, #tpu.memory_space<vmem>>, vector<16x32xf32>,
    %c1_i32 = arith.constant 1 : i32
    %279 = arith.cmpi eq, %arg1, %c1_i32 : i32
    %280 = arith.extui %279 : i1 to i32
    %c0_i32_112 = arith.constant 0 : i32
    %281 = arith.cmpi ne, %280, %c0_i32_112 : i32
    scf.if %281 {
      %c2_i32 = arith.constant 2 : i32
      %282 = arith.muli %arg0, %c2_i32 : i32
      %c0_i32_113 = arith.constant 0 : i32
      %283 = arith.addi %282, %c0_i32_113 : i32
      %284 = arith.index_cast %283 : i32 to index
      %285 = memref.load %arg2[%284] : memref<2xi32, #tpu.memory_space<smem>>
      %c0_i32_114 = arith.constant 0 : i32
      %286 = arith.addi %c0_i32_114, %285 : i32
      %287 = arith.index_cast %286 : i32 to index
      %c0_115 = arith.constant 0 : index
      %288 = vector.load %arg22[%287, %c0_115] : memref<16x32xf32, #tpu.memory_space<vmem>>, vector<1x32xf32>
      %c0_116 = arith.constant 0 : index
      %c0_117 = arith.constant 0 : index
      %289 = vector.load %arg18[%c0_116, %c0_117] : memref<1x32xf32, #tpu.memory_space<vmem>>, vector<1x32xf32>
      %290 = vector.shape_cast %289 : vector<1x32xf32> to vector<32xf32>
      %c0_118 = arith.constant 0 : index
      %c0_119 = arith.constant 0 : index
      %291 = vector.load %arg19[%c0_118, %c0_119] : memref<1x32xf32, #tpu.memory_space<vmem>>, vector<1x32xf32>
      %292 = vector.shape_cast %291 : vector<1x32xf32> to vector<32xf32>
      %cst_120 = arith.constant dense<0.000000e+00> : vector<1xf32>
      %293 = vector.multi_reduction <add>, %288, %cst_120 [1] : vector<1x32xf32> to vector<1xf32>
      %294 = vector.shape_cast %293 : vector<1xf32> to vector<1x1xf32>
      %cst_121 = arith.constant 3.200000e+01 : f32
      %295 = vector.broadcast %cst_121 : f32 to vector<1x1xf32>
      %296 = arith.divf %294, %295 : vector<1x1xf32>
      %297 = vector.broadcast %296 : vector<1x1xf32> to vector<1x32xf32>
      %298 = arith.subf %288, %297 : vector<1x32xf32>
      %299 = arith.mulf %298, %298 : vector<1x32xf32>
      %cst_122 = arith.constant dense<0.000000e+00> : vector<1xf32>
      %300 = vector.multi_reduction <add>, %299, %cst_122 [1] : vector<1x32xf32> to vector<1xf32>
      %301 = vector.shape_cast %300 : vector<1xf32> to vector<1x1xf32>
      %cst_123 = arith.constant 3.200000e+01 : f32
      %302 = vector.broadcast %cst_123 : f32 to vector<1x1xf32>
      %303 = arith.divf %301, %302 : vector<1x1xf32>
      %cst_124 = arith.constant 9.99999974E-6 : f32
      %304 = vector.broadcast %cst_124 : f32 to vector<1x1xf32>
      %305 = arith.addf %303, %304 : vector<1x1xf32>
      %306 = math.rsqrt %305 : vector<1x1xf32>
      %307 = vector.broadcast %306 : vector<1x1xf32> to vector<1x32xf32>
      %308 = arith.mulf %298, %307 : vector<1x32xf32>
      %309 = vector.shape_cast %290 : vector<32xf32> to vector<1x32xf32>
      %310 = arith.mulf %308, %309 : vector<1x32xf32>
      %311 = vector.shape_cast %292 : vector<32xf32> to vector<1x32xf32>
      %312 = arith.addf %310, %311 : vector<1x32xf32>
      %313 = arith.truncf %312 : vector<1x32xf32> to vector<1x32xbf16>
      %c0_125 = arith.constant 0 : index
      %c0_126 = arith.constant 0 : index
      %314 = vector.load %arg20[%c0_125, %c0_126] : memref<32x32xbf16, #tpu.memory_space<vmem>>, vector<32x32xbf16>
      %cst_127 = arith.constant dense<0.000000e+00> : vector<1x32xf32>
      %315 = tpu.matmul %313, %314, %cst_127 {dimension_numbers = #tpu.dot_dimension_numbers<[1], [0], [0], [1], [0, 0, 1, 1], [], []>} : vector<1x32xbf16>, vector<32x32xbf16>, vector<1x32xf32> -> vector<1x32xf32>
      %c0_128 = arith.constant 0 : index
      %c0_129 = arith.constant 0 : index
      %c0_130 = arith.constant 0 : index
      %316 = vector.load %arg21[%c0_128, %c0_129, %c0_130] : memref<1x2x32xf32, #tpu.memory_space<vmem>>, vector<1x1x32xf32>
      %317 = vector.shape_cast %316 : vector<1x1x32xf32> to vector<1x32xf32>
      %318 = vector.shape_cast %315 : vector<1x32xf32> to vector<1x1x32xf32>
      tpu.vector_store %arg21[%c0_128, %c0_129, %c0_130], %318 {strides = array<i32>} : memref<1x2x32xf32, #tpu.memory_space<vmem>>, vector<1x1x32xf32>,
      %c2_i32_131 = arith.constant 2 : i32
      %319 = arith.muli %arg0, %c2_i32_131 : i32
      %c1_i32_132 = arith.constant 1 : i32
      %320 = arith.addi %319, %c1_i32_132 : i32
      %321 = arith.index_cast %320 : i32 to index
      %322 = memref.load %arg2[%321] : memref<2xi32, #tpu.memory_space<smem>>
      %c8_i32 = arith.constant 8 : i32
      %323 = arith.addi %c8_i32, %322 : i32
      %324 = arith.index_cast %323 : i32 to index
      %c0_133 = arith.constant 0 : index
      %325 = vector.load %arg22[%324, %c0_133] : memref<16x32xf32, #tpu.memory_space<vmem>>, vector<1x32xf32>
      %c0_134 = arith.constant 0 : index
      %c0_135 = arith.constant 0 : index
      %326 = vector.load %arg18[%c0_134, %c0_135] : memref<1x32xf32, #tpu.memory_space<vmem>>, vector<1x32xf32>
      %327 = vector.shape_cast %326 : vector<1x32xf32> to vector<32xf32>
      %c0_136 = arith.constant 0 : index
      %c0_137 = arith.constant 0 : index
      %328 = vector.load %arg19[%c0_136, %c0_137] : memref<1x32xf32, #tpu.memory_space<vmem>>, vector<1x32xf32>
      %329 = vector.shape_cast %328 : vector<1x32xf32> to vector<32xf32>
      %cst_138 = arith.constant dense<0.000000e+00> : vector<1xf32>
      %330 = vector.multi_reduction <add>, %325, %cst_138 [1] : vector<1x32xf32> to vector<1xf32>
      %331 = vector.shape_cast %330 : vector<1xf32> to vector<1x1xf32>
      %cst_139 = arith.constant 3.200000e+01 : f32
      %332 = vector.broadcast %cst_139 : f32 to vector<1x1xf32>
      %333 = arith.divf %331, %332 : vector<1x1xf32>
      %334 = vector.broadcast %333 : vector<1x1xf32> to vector<1x32xf32>
      %335 = arith.subf %325, %334 : vector<1x32xf32>
      %336 = arith.mulf %335, %335 : vector<1x32xf32>
      %cst_140 = arith.constant dense<0.000000e+00> : vector<1xf32>
      %337 = vector.multi_reduction <add>, %336, %cst_140 [1] : vector<1x32xf32> to vector<1xf32>
      %338 = vector.shape_cast %337 : vector<1xf32> to vector<1x1xf32>
      %cst_141 = arith.constant 3.200000e+01 : f32
      %339 = vector.broadcast %cst_141 : f32 to vector<1x1xf32>
      %340 = arith.divf %338, %339 : vector<1x1xf32>
      %cst_142 = arith.constant 9.99999974E-6 : f32
      %341 = vector.broadcast %cst_142 : f32 to vector<1x1xf32>
      %342 = arith.addf %340, %341 : vector<1x1xf32>
      %343 = math.rsqrt %342 : vector<1x1xf32>
      %344 = vector.broadcast %343 : vector<1x1xf32> to vector<1x32xf32>
      %345 = arith.mulf %335, %344 : vector<1x32xf32>
      %346 = vector.shape_cast %327 : vector<32xf32> to vector<1x32xf32>
      %347 = arith.mulf %345, %346 : vector<1x32xf32>
      %348 = vector.shape_cast %329 : vector<32xf32> to vector<1x32xf32>
      %349 = arith.addf %347, %348 : vector<1x32xf32>
      %350 = arith.truncf %349 : vector<1x32xf32> to vector<1x32xbf16>
      %c0_143 = arith.constant 0 : index
      %c0_144 = arith.constant 0 : index
      %351 = vector.load %arg20[%c0_143, %c0_144] : memref<32x32xbf16, #tpu.memory_space<vmem>>, vector<32x32xbf16>
      %cst_145 = arith.constant dense<0.000000e+00> : vector<1x32xf32>
      %352 = tpu.matmul %350, %351, %cst_145 {dimension_numbers = #tpu.dot_dimension_numbers<[1], [0], [0], [1], [0, 0, 1, 1], [], []>} : vector<1x32xbf16>, vector<32x32xbf16>, vector<1x32xf32> -> vector<1x32xf32>
      %c0_146 = arith.constant 0 : index
      %c1 = arith.constant 1 : index
      %c0_147 = arith.constant 0 : index
      %353 = vector.load %arg21[%c0_146, %c1, %c0_147] : memref<1x2x32xf32, #tpu.memory_space<vmem>>, vector<1x1x32xf32>
      %354 = vector.shape_cast %353 : vector<1x1x32xf32> to vector<1x32xf32>
      %355 = vector.shape_cast %352 : vector<1x32xf32> to vector<1x1x32xf32>
      tpu.vector_store %arg21[%c0_146, %c1, %c0_147], %355 {strides = array<i32>} : memref<1x2x32xf32, #tpu.memory_space<vmem>>, vector<1x1x32xf32>,
    } else {
    }
    return
  }
  func.func @transform_0(%arg0: i32, %arg1: i32, %arg2: memref<2xi32, #tpu.memory_space<smem>>) -> (i32, i32, i32) {
    %c0_i32 = arith.constant 0 : i32
    %c0_i32_0 = arith.constant 0 : i32
    %c0_i32_1 = arith.constant 0 : i32
    return %arg0, %c0_i32, %c0_i32_0 : i32, i32, i32
  }
  func.func @transform_1(%arg0: i32, %arg1: i32, %arg2: memref<2xi32, #tpu.memory_space<smem>>) -> (i32, i32) {
    %c0_i32 = arith.constant 0 : i32
    %c0_i32_0 = arith.constant 0 : i32
    %c0_i32_1 = arith.constant 0 : i32
    return %c0_i32, %c0_i32_0 : i32, i32
  }
  func.func @transform_2(%arg0: i32, %arg1: i32, %arg2: memref<2xi32, #tpu.memory_space<smem>>) -> (i32, i32) {
    %c0_i32 = arith.constant 0 : i32
    %c0_i32_0 = arith.constant 0 : i32
    %c0_i32_1 = arith.constant 0 : i32
    return %c0_i32, %c0_i32_0 : i32, i32
  }
  func.func @transform_3(%arg0: i32, %arg1: i32, %arg2: memref<2xi32, #tpu.memory_space<smem>>) -> (i32, i32, i32) {
    %c0_i32 = arith.constant 0 : i32
    %c0_i32_0 = arith.constant 0 : i32
    %c0_i32_1 = arith.constant 0 : i32
    return %arg1, %c0_i32, %c0_i32_0 : i32, i32, i32
  }
  func.func @transform_4(%arg0: i32, %arg1: i32, %arg2: memref<2xi32, #tpu.memory_space<smem>>) -> (i32, i32, i32) {
    %c0_i32 = arith.constant 0 : i32
    %c0_i32_0 = arith.constant 0 : i32
    %c0_i32_1 = arith.constant 0 : i32
    return %arg1, %c0_i32, %c0_i32_0 : i32, i32, i32
  }
  func.func @transform_5(%arg0: i32, %arg1: i32, %arg2: memref<2xi32, #tpu.memory_space<smem>>) -> (i32, i32, i32) {
    %c0_i32 = arith.constant 0 : i32
    %c0_i32_0 = arith.constant 0 : i32
    %c0_i32_1 = arith.constant 0 : i32
    return %arg1, %c0_i32, %c0_i32_0 : i32, i32, i32
  }
  func.func @transform_6(%arg0: i32, %arg1: i32, %arg2: memref<2xi32, #tpu.memory_space<smem>>) -> (i32, i32, i32) {
    %c0_i32 = arith.constant 0 : i32
    %c0_i32_0 = arith.constant 0 : i32
    %c0_i32_1 = arith.constant 0 : i32
    return %arg1, %c0_i32, %c0_i32_0 : i32, i32, i32
  }
  func.func @transform_7(%arg0: i32, %arg1: i32, %arg2: memref<2xi32, #tpu.memory_space<smem>>) -> (i32, i32, i32) {
    %c0_i32 = arith.constant 0 : i32
    %c0_i32_0 = arith.constant 0 : i32
    %c0_i32_1 = arith.constant 0 : i32
    return %arg1, %c0_i32, %c0_i32_0 : i32, i32, i32
  }
  func.func @transform_8(%arg0: i32, %arg1: i32, %arg2: memref<2xi32, #tpu.memory_space<smem>>) -> (i32, i32, i32) {
    %c0_i32 = arith.constant 0 : i32
    %c0_i32_0 = arith.constant 0 : i32
    %c0_i32_1 = arith.constant 0 : i32
    return %arg1, %c0_i32, %c0_i32_0 : i32, i32, i32
  }
  func.func @transform_9(%arg0: i32, %arg1: i32, %arg2: memref<2xi32, #tpu.memory_space<smem>>) -> (i32, i32, i32) {
    %c0_i32 = arith.constant 0 : i32
    %c0_i32_0 = arith.constant 0 : i32
    %c0_i32_1 = arith.constant 0 : i32
    return %arg1, %c0_i32, %c0_i32_0 : i32, i32, i32
  }
  func.func @transform_10(%arg0: i32, %arg1: i32, %arg2: memref<2xi32, #tpu.memory_space<smem>>) -> (i32, i32, i32) {
    %c0_i32 = arith.constant 0 : i32
    %c0_i32_0 = arith.constant 0 : i32
    %c0_i32_1 = arith.constant 0 : i32
    return %arg1, %c0_i32, %c0_i32_0 : i32, i32, i32
  }
  func.func @transform_11(%arg0: i32, %arg1: i32, %arg2: memref<2xi32, #tpu.memory_space<smem>>) -> (i32, i32, i32) {
    %c0_i32 = arith.constant 0 : i32
    %c0_i32_0 = arith.constant 0 : i32
    %c0_i32_1 = arith.constant 0 : i32
    return %arg1, %c0_i32, %c0_i32_0 : i32, i32, i32
  }
  func.func @transform_12(%arg0: i32, %arg1: i32, %arg2: memref<2xi32, #tpu.memory_space<smem>>) -> (i32, i32, i32) {
    %c0_i32 = arith.constant 0 : i32
    %c0_i32_0 = arith.constant 0 : i32
    %c0_i32_1 = arith.constant 0 : i32
    return %arg1, %c0_i32, %c0_i32_0 : i32, i32, i32
  }
  func.func @transform_13(%arg0: i32, %arg1: i32, %arg2: memref<2xi32, #tpu.memory_space<smem>>) -> (i32, i32, i32) {
    %c0_i32 = arith.constant 0 : i32
    %c0_i32_0 = arith.constant 0 : i32
    %c0_i32_1 = arith.constant 0 : i32
    return %arg1, %c0_i32, %c0_i32_0 : i32, i32, i32
  }
  func.func @transform_14(%arg0: i32, %arg1: i32, %arg2: memref<2xi32, #tpu.memory_space<smem>>) -> (i32, i32, i32) {
    %c0_i32 = arith.constant 0 : i32
    %c0_i32_0 = arith.constant 0 : i32
    %c0_i32_1 = arith.constant 0 : i32
    return %arg1, %c0_i32, %c0_i32_0 : i32, i32, i32
  }
  func.func @transform_15(%arg0: i32, %arg1: i32, %arg2: memref<2xi32, #tpu.memory_space<smem>>) -> (i32, i32) {
    %c0_i32 = arith.constant 0 : i32
    %c0_i32_0 = arith.constant 0 : i32
    %c0_i32_1 = arith.constant 0 : i32
    return %c0_i32, %c0_i32_0 : i32, i32
  }
  func.func @transform_16(%arg0: i32, %arg1: i32, %arg2: memref<2xi32, #tpu.memory_space<smem>>) -> (i32, i32) {
    %c0_i32 = arith.constant 0 : i32
    %c0_i32_0 = arith.constant 0 : i32
    %c0_i32_1 = arith.constant 0 : i32
    return %c0_i32, %c0_i32_0 : i32, i32
  }
  func.func @transform_17(%arg0: i32, %arg1: i32, %arg2: memref<2xi32, #tpu.memory_space<smem>>) -> (i32, i32) {
    %c0_i32 = arith.constant 0 : i32
    %c0_i32_0 = arith.constant 0 : i32
    %c0_i32_1 = arith.constant 0 : i32
    return %c0_i32, %c0_i32_0 : i32, i32
  }
  func.func @transform_18(%arg0: i32, %arg1: i32, %arg2: memref<2xi32, #tpu.memory_space<smem>>) -> (i32, i32, i32) {
    %c0_i32 = arith.constant 0 : i32
    %c0_i32_0 = arith.constant 0 : i32
    %c0_i32_1 = arith.constant 0 : i32
    return %arg0, %c0_i32, %c0_i32_0 : i32, i32, i32
  }
}

</mosaic_0001>

<bundles_post_ra>
// kernel: tpu_custom_call.1
= control target key start
LH: loop header
LB: loop body
LE: loop exit
PB: predicated region body
PF: predicated region fallthrough
CT: control target
= control target key end

     0   :  { %s3591_s0 = inlined_call_operand.vmem [shape: s32[2], index: 0, kind: input, shape index: {}]   ;;  %s3592_s1 = inlined_call_operand.vmem [shape: bf16[2,8,32], index: 1, kind: input, shape index: {}]   ;;  %s3593_s2 = inlined_call_operand.vmem [shape: bf16[8,32], index: 2, kind: input, shape index: {}]   ;;  %s3594_s3 = inlined_call_operand.vmem [shape: f32[8,8], index: 3, kind: input, shape index: {}]   ;;  %s3595_s4 = inlined_call_operand.vmem [shape: f32[2,1,32], index: 4, kind: input, shape index: {}]   ;;  %s3596_s5 = inlined_call_operand.vmem [shape: f32[2,1,32], index: 5, kind: input, shape index: {}]   ;;  %s3597_s6 = inlined_call_operand.vmem [shape: bf16[2,32,96], index: 6, kind: input, shape index: {}]   ;;  %s3598_s7 = inlined_call_operand.vmem [shape: f32[2,1,96], index: 7, kind: input, shape index: {}]   ;;  %s3599_s8 = inlined_call_operand.vmem [shape: bf16[2,32,32], index: 8, kind: input, shape index: {}]   ;;  %s3600_s9 = inlined_call_operand.vmem [shape: f32[2,1,32], index: 9, kind: input, shape index: {}]   ;;  %s3601_s10 = inlined_call_operand.vmem [shape: f32[2,1,32], index: 10, kind: input, shape index: {}]   ;;  %s3602_s11 = inlined_call_operand.vmem [shape: f32[2,1,32], index: 11, kind: input, shape index: {}]   ;;  %s3603_s12 = inlined_call_operand.vmem [shape: bf16[2,32,128], index: 12, kind: input, shape index: {}]   ;;  %s3604_s13 = inlined_call_operand.vmem [shape: f32[2,1,128], index: 13, kind: input, shape index: {}]   ;;  %s3605_s14 = inlined_call_operand.vmem [shape: bf16[2,128,32], index: 14, kind: input, shape index: {}]   ;;  %s3606_s15 = inlined_call_operand.vmem [shape: f32[2,1,32], index: 15, kind: input, shape index: {}]   ;;  %s3607_s16 = inlined_call_operand.vmem [shape: f32[1,32], index: 16, kind: input, shape index: {}]   ;;  %s3608_s17 = inlined_call_operand.vmem [shape: f32[1,32], index: 17, kind: input, shape index: {}]   ;;  %s3609_s18 = inlined_call_operand.vmem [shape: bf16[32,32], index: 18, kind: input, shape index: {}]   ;;  %s3610_s19 = inlined_call_operand.hbm [shape: f32[1,2,32], index: 19, kind: output, shape index: {}]  }
   0x1   :  { %3616 = sst [smem:[#allocation13_spill]] %s3591_s0 }
   0x2   :  { %3617 = sst [smem:[#allocation14_spill]] %s3592_s1 }
   0x3   :  { %3618 = sst [smem:[#allocation15_spill]] %s3593_s2 }
   0x4   :  { %3619 = sst [smem:[#allocation16_spill]] %s3594_s3 }
   0x5   :  { %3620 = sst [smem:[#allocation17_spill]] %s3597_s6 }
   0x6   :  { %3621 = sst [smem:[#allocation18_spill]] %s3599_s8 }
   0x7   :  { %3622 = sst [smem:[#allocation19_spill]] %s3604_s13 }
   0x8   :  { %3623 = sst [smem:[#allocation20_spill]] %s3607_s16 }
   0x9   :  { %3624 = sst [smem:[#allocation21_spill]] %s3608_s17 }
   0xa   :  { %3625 = sst [smem:[#allocation22_spill]] %s3609_s18 }
   0xb   :  { %3626 = sst [smem:[#allocation23_spill]] %s3610_s19 }
   0xc   :  { %s3627_s20 = sld [smem:[#allocation13_spill]] }
  0x12   :  { %s24_s13 = sshll.u32 %s3627_s20, 4  ;;  %s25_s13 = int_to_ptr.vmem [resolvable:$true] %s24_s13 }
  0x13   :  { %s2964_s21 = scalar_lea.vmem %s25_s13, 16  ;;  %p2969_p1 = scmp.lt.s32.totalorder %s25_s13, %s25_s13 }
  0x14   :  { %p2965_p0 = scmp.ne.s32.totalorder %s25_s13, %s2964_s21  ;;  %p2970_p2 = scmp.lt.s32.totalorder %s2964_s21, %s2964_s21 }
  0x16   :  { %p2971_p3 = por %p2970_p2, %p2969_p1 }
  0x18   :  { %p2972_p4 = pnand %p2971_p3, %p2965_p0 }
  0x1a   :  { %2975 = shalt.err (!%p2972_p4)  }
  0x1b   :  { %s3030_s1 = smov [#allocation5]  }
  0x1c   :  { %27 = dma.vmem_to_smem %s25_s13, 16, %s3030_s1, [#allocation4] }
  0x1d   :  { %3012 = dma.done.wait [#allocation4], 16 }
  0x1e   :  { %3013 = vsyncadd [#allocation4], 4294967280 }
  0x1f   :  { %29 = sfence }
  0x20   :  { %30 = vsyncpa [#allocation7], 0  ;;  %s3153_s22 = smov 0   ;;  %s3155_s2 = smov 0  }
  0x21   :  { %s3157_s23 = smov 0  }
  0x22 LB: > { %3628 = sst [smem:[#allocation10_spill]] %s3024_s2  ;;  %s45_s24 = sadd.s32 1, %s3024_s2  ;;  %s3028_s23 = sphi %s3157_s23, %s36_s23   ;;  %s3024_s2 = sphi %s3155_s2, %s3651_s2   ;;  %s3020_s22 = sphi %s3153_s22, %s3650_s22  }
  0x23   : > { %3629 = sst [smem:[#allocation11_spill]] %s3028_s23  ;;  %p46_p5 = scmp.ge.s32.totalorder %s45_s24, 2 }
  0x24   : > { %p2547_p6 = scmp.ge.s32.totalorder %s3028_s23, 1  ;;  %p637_p7 = scmp.lt.s32.totalorder %s3028_s23, 3 }
  0x25   : > { %s3653_s24 = smov (%p46_p5, %s45_s24), 0 }
  0x26   : > { %3630 = sst [smem:[#allocation12_spill]] %s3653_s24  ;;  %p638_p8 = pnand %p2547_p6, %p637_p7 }
  0x27   : > { %p736_p9 = scmp.lt.s32.totalorder (!%p638_p8), %s3020_s22, 1  ;;  %s3631_s6 = sld [smem:[#allocation17_spill]] (!%p638_p8) }
  0x28   : > { %641 = sbr.rel (%p638_p8) target bundleno = 3155 (0xc53), region = 92  ;;  %s3632_s8 = sld [smem:[#allocation18_spill]] (!%p638_p8) }
  0x29   : > { %p2556_p10 = scmp.ne.s32.totalorder (!%p638_p8), %s3020_s22, 0 }
  0x2d   : > { %s3176_s25 = scalar_select %p736_p9, %s3020_s22, 1 }
  0x2e   : > { %s3634_s3 = sld [smem:[#allocation15_spill]] (!%p2556_p10) }
  0x2f   : > { %s2621_s30 = sshll.u32 %s3176_s25, 4  ;;  %s760_s17 = scalar_lea.vmem %s3601_s10, %s3176_s25 }
  0x30   : > { %s3194_s13 = scalar_lea.vmem %s3631_s6, %s2621_s30  ;;  %s3199_s19 = scalar_lea.vmem %s3632_s8, %s2621_s30 }
  0x31   : > { %s763_s1 = scalar_lea.vmem %s3602_s11, %s3176_s25  ;;  %s3216_s6 = scalar_lea.vmem %s3603_s12, %s2621_s30 }
  0x32   : > { %s3633_s8 = sld [smem:[#allocation19_spill]]  ;;  %s2624_s18 = sshll.u32 %s3176_s25, 6 }
  0x33   : > { %s3226_s28 = scalar_lea.vmem %s3605_s14, %s2624_s18  ;;  %s779_s20 = scalar_lea.vmem %s3606_s15, %s3176_s25 }
  0x34   : > { %784 = sbr.rel (%p2556_p10) target bundleno = 68 (0x44), region = 96 }
  0x38   : > { %s771_s16 = scalar_lea.vmem %s3633_s8, %s3176_s25  ;;  %s3635_s8 = sld [smem:[#allocation14_spill]] (!%p2556_p10) }
  0x39   : > { %v785_v0 = vld [vmem:[%s3634_s3] sm:$0xf]  ;;  %vm790_vm0 = vcmask 261120  }
  0x3a   : > { %v786_v2 = vunpack.c.l.bf16 %v785_v0 }
  0x3e   : > { %v787_v1 = vld [vmem:[%s3635_s8] sm:$0xff]  }
  0x3f   : > { %v788_v3 = vunpack.c.l.bf16 %v787_v1  ;;  %v794_v4 = vunpack.c.h.bf16 %v787_v1 }
  0x41   : > { %v789_v5 = vadd.f32 %v788_v3, %v786_v2  ;;  %v795_v6 = vadd.f32 %v794_v4, %v786_v2 }
  0x43   : > { %791 = vst.msk [vmem:[#allocation2] sm:$0xff] %vm790_vm0, %v789_v5  ;;  %796 = vst.msk [vmem:[#allocation2 + $0x8] sm:$0xff] %vm790_vm0, %v795_v6 }
  0x44 PF: > { %vm802_vm1 = vcmask 261120   ;;  %v2893_v21 = vld [vmem:[%s3194_s13 + $0x8] sm:$0xff]   ;;  %v3031_v22 = vmov 0.0   ;;  %vm3032_vm2 = vmmov 0   ;;  %v2894_v23 = vld [vmem:[%s3194_s13] sm:$0xff]   ;;  %s3636_s24 = scalar_lea.vmem %s3595_s4, %s3176_s25  ;;  %s3637_s0 = scalar_lea.vmem %s3596_s5, %s3176_s25  ;;  %vm918_vm3 = vcmask 64512  }
  0x45   : > { %2687 = vmatprep.subr.bf16.mxu0 %v3031_v22  ;;  %2691 = vmatprep.mubr.msk.bf16.mxu0 %vm3032_vm2, %v3031_v22  ;;  %v2558_v32 = vld [vmem:[%s3636_s24] ss:$0 sm:$0xff]  ;;  %s3638_s30 = scalar_lea.vmem %s3598_s7, %s3176_s25  ;;  %s3033_s3 = smov 88   ;;  %vm984_vm4 = vcmask 1043456   ;;  %vm1029_vm5 = vcmask 60416   ;;  %vm1150_vm6 = vcmask 126016  }
  0x46   : > { %2688 = vmatpush3.bf16.msra.mxu0 %v2893_v21  ;;  %2707 = vmatprep.subr.bf16.mxu1 %v3031_v22  ;;  %v2559_v36 = vld [vmem:[%s3637_s0] ss:$0 sm:$0xff]  ;;  %s3034_s26 = smov 96   ;;  %s3035_s2 = smov 120   ;;  %vm1271_vm7 = vcmask 191616   ;;  %vm1392_vm8 = vcmask 257216  }
  0x47   : > { %2689 = vmatprep.subr.bf16.mxu0 %v3031_v22  ;;  %2709 = vmatprep.mubr.msk.bf16.mxu1 %vm3032_vm2, %v3031_v22  ;;  %v2560_v42 = vld [vmem:[%s3638_s30] ss:$0 sm:$0xff]  ;;  %s3036_s8 = smov 112   ;;  %s3037_s18 = smov 80  }
  0x48   : > { %s3038_s13 = smov 104   ;;  %s3039_s24 = smov 72  }
  0x49   : > { %s3639_s0 = sld [smem:[#allocation16_spill]]  ;;  %s3040_s29 = smov 56  }
  0x4a   : > { %v3239_v7 = vld [vmem:[#allocation2] sm:$0xff]  ;;  %v3241_v8 = vld [vmem:[#allocation2 + $0x8] sm:$0xff]  ;;  %2690 = vmatpush3.bf16.msra.mxu0 %v2894_v23  ;;  %s3041_s21 = smov 64   ;;  %s3042_s30 = smov 48  }
  0x4b   : > { %v803_v9 = vsel %vm802_vm1, %v3239_v7, 0.0  ;;  %v806_v10 = vsel %vm802_vm1, %v3241_v8, 0.0  ;;  %2695 = vmatprep.subr.bf16.mxu0 %v3031_v22  ;;  %p2608_p11 = scmp.ne.s32.totalorder %s3020_s22, 1 }
  0x4c   : > { %804 = vadd.xlane.f32.xlu0 %v803_v9 }
  0x50   : > { %807 = vadd.xlane.f32.xlu0 %v806_v10 }
  0xd5   : > { %v805_v11 = vpop.xlane.xlu0 %804 }
  0xd6   : > { %v810_v12 = vmul.f32 0.03125, %v805_v11 }
  0xd8   : > { %v812_v13 = vsub.f32 %v3239_v7, %v810_v12  ;;  %v3343_v12 = vld [vmem:[%s3639_s0] sm:$0xff] }
  0xd9   : > { %v808_v14 = vpop.xlane.xlu0 %807 }
  0xda   : > { %v811_v15 = vmul.f32 0.03125, %v808_v14  ;;  %v814_v16 = vmul.f32 %v812_v13, %v812_v13 }
  0xdc   : > { %v813_v17 = vsub.f32 %v3241_v8, %v811_v15  ;;  %v816_v18 = vsel %vm802_vm1, %v814_v16, 0.0 }
  0xdd   : > { %817 = vadd.xlane.f32.xlu1 %v816_v18 }
  0xde   : > { %v815_v19 = vmul.f32 %v813_v17, %v813_v17 }
  0xe0   : > { %v819_v20 = vsel %vm802_vm1, %v815_v19, 0.0 }
  0xe1   : > { %820 = vadd.xlane.f32.xlu1 %v819_v20 }
 0x166   : > { %v818_v24 = vpop.xlane.xlu1 %817 }
 0x167   : > { %v822_v25 = vmul.f32 0.03125, %v818_v24 }
 0x169   : > { %v824_v26 = vadd.f32 1e-05, %v822_v25 }
 0x16a   : > { %v821_v27 = vpop.xlane.xlu1 %820 }
 0x16b   : > { %2908 = vrsqrt.f32 %v824_v26  ;;  %v823_v28 = vmul.f32 0.03125, %v821_v27 }
 0x16d   : > { %v825_v29 = vadd.f32 1e-05, %v823_v28 }
 0x16f   : > { %2910 = vrsqrt.f32 %v825_v29 }
 0x178   : > { %v2909_v30 = vpop.eup %2908 }
 0x179   : > { %v828_v31 = vmul.f32 %v2909_v30, %v812_v13 }
 0x17b   : > { %v836_v35 = vmul.f32 %v2558_v32, %v828_v31 }
 0x17c   : > { %v2911_v33 = vpop.eup %2910 }
 0x17d   : > { %v829_v34 = vmul.f32 %v2911_v33, %v813_v17  ;;  %v844_v38 = vadd.f32 %v2559_v36, %v836_v35 }
 0x17f   : > { %v837_v37 = vmul.f32 %v2558_v32, %v829_v34 }
 0x181   : > { %v845_v39 = vadd.f32 %v2559_v36, %v837_v37 }
 0x183   : > { %v846_v40 = vpack.c.bf16 %v845_v39, %v844_v38 }
 0x185   : > { %2692 = vmatmul.mubr.msk.bf16.vlgmr.msra.gmra.mxu0 %vm802_vm1, %v846_v40 }
 0x186   : > { %2697 = vmatprep.mubr.msk.bf16.mxu0 %vm3032_vm2, %v3031_v22 }
 0x245   : > { %v907_v41 = vpop.f32.mrf.mxu0 }
 0x246   : > { %v908_v45 = vadd.f32 %v2560_v42, %v907_v41 }
 0x247   : > { %v2693_v43 = vpop.f32.mrf.mxu0 }
 0x249   : > { %v910_v44 = vpop.f32.mrf.mxu0 }
 0x24a   : > { %v911_v46 = vadd.f32 %v2560_v42, %v910_v44 }
 0x24b   : > { %v2694_v47 = vpop.f32.mrf.mxu0 }
 0x24c   : > { %v3279_v48 = vpack.c.bf16 %v911_v46, %v908_v45 }
 0x24e   : > { %1033 = vrot.lane.b32.xlu1 %v3279_v48, %s3033_s3  ;;  %916 = vrot.lane.b32.xlu0 %v3279_v48, %s3034_s26  ;;  %v3288_v49 = vrot.slane %v3279_v48, 4 }
 0x252   : > { %1031 = vrot.lane.b32.xlu1 %v3279_v48, %s3035_s2  ;;  %1152 = vrot.lane.b32.xlu0 %v3279_v48, %s3036_s8 }
 0x256   : > { %1154 = vrot.lane.b32.xlu1 %v3279_v48, %s3037_s18  ;;  %1273 = vrot.lane.b32.xlu0 %v3279_v48, %s3038_s13 }
 0x25a   : > { %1275 = vrot.lane.b32.xlu1 %v3279_v48, %s3039_s24  ;;  %1509 = vrot.lane.b32.xlu0 %v3288_v49, %s3033_s3  ;;  %s3043_s3 = smov 40  }
 0x25e   : > { %1629 = vrot.lane.b32.xlu0 %v3288_v49, %s3037_s18  ;;  %1395 = vrot.lane.b32.xlu1 %v3288_v49, %s3034_s26  ;;  %s3044_s26 = smov 8  }
 0x262   : > { %1749 = vrot.lane.b32.xlu0 %v3288_v49, %s3039_s24  ;;  %1507 = vrot.lane.b32.xlu1 %v3288_v49, %s3035_s2  ;;  %s3045_s2 = smov 16  }
 0x266   : > { %1627 = vrot.lane.b32.xlu1 %v3288_v49, %s3036_s8  ;;  %s3046_s8 = smov 24  }
 0x26a   : > { %1747 = vrot.lane.b32.xlu1 %v3288_v49, %s3038_s13  ;;  %s3640_s13 = scalar_lea.vmem %s3600_s9, %s3176_s25  ;;  %s2612_s25 = sld [smem:[#allocation5 + $0x1]] (!%p2608_p11) }
 0x2c0   : > { %v1034_v50 = vpop.permute.xlu1 %1033  ;;  %v917_v51 = vpop.permute.xlu0 %916 }
 0x2c1   : > { %v923_v52 = vsel %vm918_vm3, %v917_v51, 0  ;;  %v1039_v53 = vsel %vm918_vm3, %v1034_v50, 0 }
 0x2c2   : > { %2696 = vmatpush3.bf16.xpose.msra.mxu0 %v923_v52  ;;  %2708 = vmatpush3.bf16.xpose.msra.mxu1 %v1039_v53 }
 0x2c3   : > { %2719 = vmatprep.subr.bf16.mxu1 %v3031_v22  ;;  %2701 = vmatprep.subr.bf16.mxu0 %v3031_v22 }
 0x2c4   : > { %v1032_v54 = vpop.permute.xlu1 %1031  ;;  %v1153_v58 = vpop.permute.xlu0 %1152 }
 0x2c8   : > { %v1155_v55 = vpop.permute.xlu1 %1154  ;;  %v1274_v61 = vpop.permute.xlu0 %1273 }
 0x2c9   : > { %v1160_v56 = vsel %vm918_vm3, %v1155_v55, 0  ;;  %2698 = vmatmul.mubr.msk.bf16.vlgmr.msra.gmra.mxu0 %vm918_vm3, %v3279_v48  ;;  %2710 = vmatmul.mubr.msk.bf16.vlgmr.msra.gmra.mxu1 %vm918_vm3, %v1032_v54 }
 0x2ca   : > { %2720 = vmatpush3.bf16.xpose.msra.mxu1 %v1160_v56  ;;  %2721 = vmatprep.mubr.msk.bf16.mxu1 %vm3032_vm2, %v3031_v22 }
 0x2cb   : > { %2731 = vmatprep.subr.bf16.mxu1 %v3031_v22  ;;  %2703 = vmatprep.mubr.msk.bf16.mxu0 %vm3032_vm2, %v3031_v22 }
 0x2cc   : > { %v1276_v57 = vpop.permute.xlu1 %1275  ;;  %v1510_v63 = vpop.permute.xlu0 %1509 }
 0x2cd   : > { %v1281_v59 = vsel %vm918_vm3, %v1276_v57, 0  ;;  %v1515_v0 = vsel %vm918_vm3, %v1510_v63, 0 }
 0x2d0   : > { %v1396_v60 = vpop.permute.xlu1 %1395  ;;  %v1630_v1 = vpop.permute.xlu0 %1629 }
 0x2d1   : > { %2722 = vmatmul.mubr.msk.bf16.vlgmr.msra.gmra.mxu1 %vm918_vm3, %v1153_v58  ;;  %v1401_v62 = vsel %vm918_vm3, %v1396_v60, 0  ;;  %v1635_v3 = vsel %vm918_vm3, %v1630_v1, 0 }
 0x2d2   : > { %2732 = vmatpush3.bf16.xpose.msra.mxu1 %v1281_v59  ;;  %2733 = vmatprep.mubr.msk.bf16.mxu1 %vm3032_vm2, %v3031_v22 }
 0x2d3   : > { %2743 = vmatprep.subr.bf16.mxu1 %v3031_v22 }
 0x2d4   : > { %v1508_v2 = vpop.permute.xlu1 %1507  ;;  %v1750_v4 = vpop.permute.xlu0 %1749 }
 0x2d5   : > { %v1755_v6 = vsel %vm918_vm3, %v1750_v4, 0 }
 0x2d8   : > { %v1628_v5 = vpop.permute.xlu1 %1627 }
 0x2d9   : > { %2734 = vmatmul.mubr.msk.bf16.vlgmr.msra.gmra.mxu1 %vm918_vm3, %v1274_v61 }
 0x2da   : > { %2744 = vmatpush3.bf16.xpose.msra.mxu1 %v1401_v62  ;;  %2745 = vmatprep.mubr.msk.bf16.mxu1 %vm3032_vm2, %v3031_v22 }
 0x2db   : > { %2755 = vmatprep.subr.bf16.mxu1 %v3031_v22 }
 0x2dc   : > { %v1748_v9 = vpop.permute.xlu1 %1747 }
 0x2e1   : > { %2746 = vmatmul.mubr.msk.bf16.vlgmr.msra.gmra.mxu1 %vm918_vm3, %v3288_v49 }
 0x2e2   : > { %2756 = vmatpush3.bf16.xpose.msra.mxu1 %v1515_v0  ;;  %2757 = vmatprep.mubr.msk.bf16.mxu1 %vm3032_vm2, %v3031_v22 }
 0x2e3   : > { %2767 = vmatprep.subr.bf16.mxu1 %v3031_v22 }
 0x2e9   : > { %2758 = vmatmul.mubr.msk.bf16.vlgmr.msra.gmra.mxu1 %vm918_vm3, %v1508_v2 }
 0x2ea   : > { %2768 = vmatpush3.bf16.xpose.msra.mxu1 %v1635_v3  ;;  %2769 = vmatprep.mubr.msk.bf16.mxu1 %vm3032_vm2, %v3031_v22 }
 0x2eb   : > { %2779 = vmatprep.subr.bf16.mxu1 %v3031_v22 }
 0x2f1   : > { %2770 = vmatmul.mubr.msk.bf16.vlgmr.msra.gmra.mxu1 %vm918_vm3, %v1628_v5 }
 0x2f2   : > { %2780 = vmatpush3.bf16.xpose.msra.mxu1 %v1755_v6  ;;  %2781 = vmatprep.mubr.msk.bf16.mxu1 %vm3032_vm2, %v3031_v22 }
 0x2f3   : > { %2791 = vmatprep.subr.bf16.mxu1 %v3031_v22 }
 0x2f9   : > { %2782 = vmatmul.mubr.msk.bf16.vlgmr.msra.gmra.mxu1 %vm918_vm3, %v1748_v9 }
 0x2fa   : > { %2795 = vmatprep.mubr.msk.bf16.mxu1 %vm3032_vm2, %v3031_v22 }
 0x389   : > { %v959_v10 = vpop.f32.mrf.mxu0  ;;  %v1075_v11 = vpop.f32.mrf.mxu1 }
 0x38a   : > { %v965_v13 = vmul.f32 0.35355338, %v959_v10  ;;  %v1081_v14 = vmul.f32 0.35355338, %v1075_v11 }
 0x38b   : > { %v2699_v15 = vpop.f32.mrf.mxu0  ;;  %v2711_v16 = vpop.f32.mrf.mxu1 }
 0x38c   : > { %v3346_v17 = vadd.f32 %v1081_v14, %v3343_v12  ;;  %v3349_v18 = vadd.f32 %v965_v13, %v3343_v12 }
 0x38d   : > { %v962_v19 = vpop.f32.mrf.mxu0  ;;  %v1078_v20 = vpop.f32.mrf.mxu1 }
 0x38e   : > { %v1083_v21 = vsel %vm918_vm3, %v3346_v17, -inf  ;;  %v967_v23 = vsel %vm918_vm3, %v3349_v18, -inf }
 0x38f   : > { %v2712_v24 = vpop.f32.mrf.mxu1  ;;  %1084 = vmax.xlane.f32.xlu1 %v1083_v21  ;;  %968 = vmax.xlane.f32.xlu0 %v967_v23  ;;  %v2700_v25 = vpop.f32.mrf.mxu0 }
 0x391   : > { %v1196_v26 = vpop.f32.mrf.mxu1 }
 0x392   : > { %v1202_v47 = vmul.f32 0.35355338, %v1196_v26 }
 0x393   : > { %v2723_v27 = vpop.f32.mrf.mxu1 }
 0x394   : > { %v1203_v53 = vadd.f32 %v1202_v47, %v3343_v12 }
 0x395   : > { %v1199_v28 = vpop.f32.mrf.mxu1 }
 0x396   : > { %v1204_v58 = vsel %vm918_vm3, %v1203_v53, -inf }
 0x397   : > { %v2724_v29 = vpop.f32.mrf.mxu1 }
 0x399   : > { %v1317_v30 = vpop.f32.mrf.mxu1 }
 0x39a   : > { %v1323_v54 = vmul.f32 0.35355338, %v1317_v30 }
 0x39b   : > { %v2735_v31 = vpop.f32.mrf.mxu1 }
 0x39c   : > { %v1324_v62 = vadd.f32 %v1323_v54, %v3343_v12 }
 0x39d   : > { %v1320_v32 = vpop.f32.mrf.mxu1 }
 0x39e   : > { %v1325_v1 = vsel %vm918_vm3, %v1324_v62, -inf }
 0x39f   : > { %v2736_v33 = vpop.f32.mrf.mxu1 }
 0x3a0   : > { %1095 = vrot.lane.b32.xlu1 %v3279_v48, %s3040_s29 }
 0x3a1   : > { %v1437_v34 = vpop.f32.mrf.mxu1 }
 0x3a2   : > { %v1443_v59 = vmul.f32 0.35355338, %v1437_v34 }
 0x3a3   : > { %v2747_v35 = vpop.f32.mrf.mxu1 }
 0x3a4   : > { %v1444_v2 = vadd.f32 %v1443_v59, %v3343_v12 }
 0x3a5   : > { %v1440_v36 = vpop.f32.mrf.mxu1  ;;  %979 = vrot.lane.b32.xlu0 %v3279_v48, %s3041_s21 }
 0x3a6   : > { %v1445_v3 = vsel %vm918_vm3, %v1444_v2, -inf }
 0x3a7   : > { %v2748_v37 = vpop.f32.mrf.mxu1 }
 0x3a9   : > { %v1551_v38 = vpop.f32.mrf.mxu1 }
 0x3aa   : > { %v1557_v50 = vmul.f32 0.35355338, %v1551_v38 }
 0x3ab   : > { %v2759_v39 = vpop.f32.mrf.mxu1 }
 0x3ac   : > { %v1558_v57 = vadd.f32 %v1557_v50, %v3343_v12 }
 0x3ad   : > { %v1554_v40 = vpop.f32.mrf.mxu1 }
 0x3ae   : > { %v1559_v60 = vsel %vm918_vm3, %v1558_v57, -inf }
 0x3af   : > { %v2760_v41 = vpop.f32.mrf.mxu1 }
 0x3b1   : > { %v1671_v42 = vpop.f32.mrf.mxu1 }
 0x3b2   : > { %v1677_v63 = vmul.f32 0.35355338, %v1671_v42 }
 0x3b3   : > { %v2771_v43 = vpop.f32.mrf.mxu1 }
 0x3b4   : > { %v1678_v4 = vadd.f32 %v1677_v63, %v3343_v12 }
 0x3b5   : > { %v1674_v44 = vpop.f32.mrf.mxu1 }
 0x3b6   : > { %v1679_v5 = vsel %vm918_vm3, %v1678_v4, -inf }
 0x3b7   : > { %v2772_v45 = vpop.f32.mrf.mxu1 }
 0x3b9   : > { %v1791_v46 = vpop.f32.mrf.mxu1 }
 0x3ba   : > { %v1797_v55 = vmul.f32 0.35355338, %v1791_v46 }
 0x3bb   : > { %v2783_v51 = vpop.f32.mrf.mxu1 }
 0x3bc   : > { %v3364_v61 = vadd.f32 %v1797_v55, %v3343_v12 }
 0x3bd   : > { %v1794_v52 = vpop.f32.mrf.mxu1 }
 0x3be   : > { %v1799_v0 = vsel %vm918_vm3, %v3364_v61, -inf }
 0x3bf   : > { %v2784_v56 = vpop.f32.mrf.mxu1 }
 0x3c4   : > { %1560 = vmax.xlane.f32.xlu1 %v1559_v60  ;;  %1205 = vmax.xlane.f32.xlu0 %v1204_v58 }
 0x3c8   : > { %1800 = vmax.xlane.f32.xlu1 %v1799_v0  ;;  %1326 = vmax.xlane.f32.xlu0 %v1325_v1 }
 0x3cc   : > { %1446 = vmax.xlane.f32.xlu0 %v1445_v3 }
 0x3d0   : > { %1680 = vmax.xlane.f32.xlu0 %v1679_v5 }
 0x3e6   : > { %1216 = vrot.lane.b32.xlu0 %v3279_v48, %s3042_s30 }
 0x418   : > { %v1085_v6 = vpop.xlane.xlu1 %1084  ;;  %v969_v9 = vpop.xlane.xlu0 %968 }
 0x419   : > { %v1086_v10 = vsub.f32 %v3346_v17, %v1085_v6  ;;  %v970_v11 = vsub.f32 %v3349_v18, %v969_v9 }
 0x41b   : > { %v1087_v13 = vmul.f32 1.442695, %v1086_v10  ;;  %v971_v14 = vmul.f32 1.442695, %v970_v11 }
 0x41c   : > { %v980_v15 = vpop.permute.xlu0 %979  ;;  %v1096_v21 = vpop.permute.xlu1 %1095 }
 0x41d   : > { %2912 = vpow2.f32 %v1087_v13  ;;  %v986_v12 = vsel %vm984_vm4, %v980_v15, 0  ;;  %v1101_v60 = vsel %vm984_vm4, %v1096_v21, 0 }
 0x41e   : > { %2914 = vpow2.f32 %v971_v14  ;;  %2702 = vmatpush3.bf16.msra.mxu0 %v986_v12 }
 0x41f   : > { %2713 = vmatprep.subr.bf16.mxu0 %v3031_v22 }
 0x42a   : > { %v3380_v16 = vpop.eup %2912 }
 0x42b   : > { %v2915_v19 = vpop.eup %2914  ;;  %v1089_v20 = vsel %vm918_vm3, %v3380_v16, 0.0 }
 0x42c   : > { %1090 = vadd.xlane.f32.xlu1 %v1089_v20  ;;  %v973_v17 = vsel %vm918_vm3, %v2915_v19, 0.0 }
 0x42d   : > { %974 = vadd.xlane.f32.xlu0 %v973_v17 }
 0x43d   : > { %1457 = vrot.lane.b32.xlu1 %v3288_v49, %s3041_s21  ;;  %s2438_s21 = scalar_lea.vmem (!%p2608_p11), [#allocation2], %s2612_s25 }
 0x44d   : > { %v1206_v18 = vpop.xlane.xlu0 %1205  ;;  %v1561_v26 = vpop.xlane.xlu1 %1560 }
 0x44e   : > { %v1207_v23 = vsub.f32 %v1203_v53, %v1206_v18  ;;  %v1562_v29 = vsub.f32 %v1558_v57, %v1561_v26 }
 0x450   : > { %v1208_v24 = vmul.f32 1.442695, %v1207_v23  ;;  %v1563_v33 = vmul.f32 1.442695, %v1562_v29 }
 0x451   : > { %v1327_v25 = vpop.xlane.xlu0 %1326  ;;  %v1801_v45 = vpop.xlane.xlu1 %1800 }
 0x452   : > { %v1328_v27 = vsub.f32 %v1324_v62, %v1327_v25  ;;  %2916 = vpow2.f32 %v1208_v24  ;;  %v1802_v46 = vsub.f32 %v3364_v61, %v1801_v45 }
 0x454   : > { %v1329_v28 = vmul.f32 1.442695, %v1328_v27  ;;  %v1803_v47 = vmul.f32 1.442695, %v1802_v46 }
 0x455   : > { %v1447_v30 = vpop.xlane.xlu0 %1446 }
 0x456   : > { %v1448_v31 = vsub.f32 %v1444_v2, %v1447_v30  ;;  %2918 = vpow2.f32 %v1329_v28 }
 0x458   : > { %v1449_v32 = vmul.f32 1.442695, %v1448_v31 }
 0x459   : > { %v1681_v42 = vpop.xlane.xlu0 %1680 }
 0x45a   : > { %2920 = vpow2.f32 %v1449_v32  ;;  %v1682_v43 = vsub.f32 %v1678_v4, %v1681_v42 }
 0x45b   : > { %2922 = vpow2.f32 %v1563_v33 }
 0x45c   : > { %v1683_v44 = vmul.f32 1.442695, %v1682_v43 }
 0x45d   : > { %v1217_v53 = vpop.permute.xlu0 %1216 }
 0x45e   : > { %2924 = vpow2.f32 %v1683_v44  ;;  %v1222_v62 = vsel %vm984_vm4, %v1217_v53, 0 }
 0x45f   : > { %v2917_v34 = vpop.eup %2916  ;;  %2926 = vpow2.f32 %v1803_v47 }
 0x460   : > { %v1210_v35 = vsel %vm918_vm3, %v2917_v34, 0.0 }
 0x461   : > { %1211 = vadd.xlane.f32.xlu0 %v1210_v35 }
 0x463   : > { %v3388_v36 = vpop.eup %2918 }
 0x464   : > { %v1331_v37 = vsel %vm918_vm3, %v3388_v36, 0.0 }
 0x465   : > { %1332 = vadd.xlane.f32.xlu1 %v1331_v37 }
 0x467   : > { %v3392_v38 = vpop.eup %2920 }
 0x468   : > { %v1451_v39 = vsel %vm918_vm3, %v3392_v38, 0.0  ;;  %v3396_v40 = vpop.eup %2922 }
 0x469   : > { %1452 = vadd.xlane.f32.xlu1 %v1451_v39  ;;  %v1565_v41 = vsel %vm918_vm3, %v3396_v40, 0.0 }
 0x46b   : > { %v3404_v50 = vpop.eup %2924 }
 0x46c   : > { %v1685_v51 = vsel %vm918_vm3, %v3404_v50, 0.0  ;;  %v3408_v52 = vpop.eup %2926 }
 0x46d   : > { %1566 = vadd.xlane.f32.xlu1 %v1565_v41 }
 0x477   : > { %1337 = vrot.lane.b32.xlu0 %v3279_v48, %s3043_s3  ;;  %v1805_v48 = vsel %vm918_vm3, %v3408_v52, 0.0 }
 0x47e   : > { %1571 = vrot.lane.b32.xlu1 %v3288_v49, %s3040_s29  ;;  %s2193_s29 = sld [smem:[#allocation5]] (!%p2608_p11) }
 0x496   : > { %1686 = vadd.xlane.f32.xlu0 %v1685_v51 }
 0x4a2   : > { %1806 = vadd.xlane.f32.xlu1 %v1805_v48 }
 0x4ac   : > { %1691 = vrot.lane.b32.xlu0 %v3288_v49, %s3042_s30 }
 0x4b3   : > { %1811 = vrot.lane.b32.xlu1 %v3288_v49, %s3043_s3  ;;  %s3642_s3 = sld [smem:[#allocation22_spill]] (!%p2608_p11) }
 0x4b5   : > { %v1091_v55 = vpop.xlane.xlu1 %1090 }
 0x4b6   : > { %v975_v54 = vpop.xlane.xlu0 %974 }
 0x4b7   : > { %2928 = vrcp.f32 %v975_v54 }
 0x4b8   : > { %2930 = vrcp.f32 %v1091_v55 }
 0x4b9   : > { %v1458_v63 = vpop.permute.xlu1 %1457 }
 0x4ba   : > { %v1463_v12 = vsel %vm984_vm4, %v1458_v63, 0 }
 0x4c4   : > { %v2929_v56 = vpop.eup %2928 }
 0x4c5   : > { %v977_v57 = vmul.f32 %v2929_v56, %v2915_v19  ;;  %v2931_v59 = vpop.eup %2930 }
 0x4c6   : > { %v1093_v49 = vmul.f32 %v2931_v59, %v3380_v16 }
 0x4c7   : > { %v978_v58 = vpack.c.bf16 %v977_v57, %v977_v57 }
 0x4c8   : > { %v1094_v61 = vpack.c.bf16 %v1093_v49, %v1093_v49 }
 0x4c9   : > { %2704 = vmatmul.mubr.msk.bf16.vlgmr.msra.gmra.mxu0 %vm918_vm3, %v978_v58 }
 0x4ca   : > { %2714 = vmatpush3.bf16.msra.mxu0 %v1101_v60  ;;  %2715 = vmatprep.mubr.msk.bf16.mxu0 %vm3032_vm2, %v3031_v22 }
 0x4cb   : > { %2725 = vmatprep.subr.bf16.mxu0 %v3031_v22 }
 0x4d1   : > { %2716 = vmatmul.mubr.msk.bf16.vlgmr.msra.gmra.mxu0 %vm918_vm3, %v1094_v61 }
 0x4d2   : > { %2726 = vmatpush3.bf16.msra.mxu0 %v1222_v62  ;;  %2727 = vmatprep.mubr.msk.bf16.mxu0 %vm3032_vm2, %v3031_v22 }
 0x4d3   : > { %2737 = vmatprep.subr.bf16.mxu0 %v3031_v22 }
 0x4ea   : > { %v1212_v0 = vpop.xlane.xlu0 %1211 }
 0x4eb   : > { %2932 = vrcp.f32 %v1212_v0 }
 0x4ee   : > { %v1333_v1 = vpop.xlane.xlu1 %1332  ;;  %v1338_v5 = vpop.permute.xlu0 %1337 }
 0x4ef   : > { %2934 = vrcp.f32 %v1333_v1  ;;  %v1343_v11 = vsel %vm984_vm4, %v1338_v5, 0  ;;  %v2895_v5 = vld [vmem:[%s3199_s19 + $0x8] sm:$0xff]  }
 0x4f0   : > { %2792 = vmatpush3.bf16.msra.mxu1 %v2895_v5  ;;  %v2907_v5 = vld [vmem:[%s3226_s28] sm:$0xff]  }
 0x4f1   : > { %2793 = vmatprep.subr.bf16.mxu1 %v3031_v22 }
 0x4f2   : > { %v1453_v2 = vpop.xlane.xlu1 %1452 }
 0x4f3   : > { %2936 = vrcp.f32 %v1453_v2 }
 0x4f6   : > { %v1567_v10 = vpop.xlane.xlu1 %1566 }
 0x4f7   : > { %2938 = vrcp.f32 %v1567_v10 }
 0x4f8   : > { %v2933_v3 = vpop.eup %2932 }
 0x4f9   : > { %v1214_v4 = vmul.f32 %v2933_v3, %v2917_v34 }
 0x4fa   : > { %v1572_v19 = vpop.permute.xlu1 %1571 }
 0x4fb   : > { %v1215_v6 = vpack.c.bf16 %v1214_v4, %v1214_v4  ;;  %v1577_v18 = vsel %vm984_vm4, %v1572_v19, 0 }
 0x4fc   : > { %v2935_v9 = vpop.eup %2934 }
 0x4fd   : > { %2728 = vmatmul.mubr.msk.bf16.vlgmr.msra.gmra.mxu0 %vm918_vm3, %v1215_v6  ;;  %v1335_v13 = vmul.f32 %v2935_v9, %v3388_v36  ;;  %v2896_v9 = vld [vmem:[%s3199_s19] sm:$0xff]  }
 0x4fe   : > { %2738 = vmatpush3.bf16.msra.mxu0 %v1343_v11  ;;  %2739 = vmatprep.mubr.msk.bf16.mxu0 %vm3032_vm2, %v3031_v22 }
 0x4ff   : > { %2749 = vmatprep.subr.bf16.mxu0 %v3031_v22  ;;  %v1336_v14 = vpack.c.bf16 %v1335_v13, %v1335_v13  ;;  %2794 = vmatpush3.bf16.msra.mxu1 %v2896_v9 }
 0x500   : > { %v2937_v15 = vpop.eup %2936  ;;  %2807 = vmatprep.subr.bf16.mxu1 %v3031_v22 }
 0x501   : > { %v1455_v16 = vmul.f32 %v2937_v15, %v3392_v38 }
 0x503   : > { %v1456_v20 = vpack.c.bf16 %v1455_v16, %v1455_v16 }
 0x504   : > { %v2939_v17 = vpop.eup %2938 }
 0x505   : > { %2740 = vmatmul.mubr.msk.bf16.vlgmr.msra.gmra.mxu0 %vm918_vm3, %v1336_v14  ;;  %v1569_v21 = vmul.f32 %v2939_v17, %v3396_v40 }
 0x506   : > { %2750 = vmatpush3.bf16.msra.mxu0 %v1463_v12  ;;  %2751 = vmatprep.mubr.msk.bf16.mxu0 %vm3032_vm2, %v3031_v22 }
 0x507   : > { %2761 = vmatprep.subr.bf16.mxu0 %v3031_v22  ;;  %v1570_v23 = vpack.c.bf16 %v1569_v21, %v1569_v21 }
 0x50d   : > { %2752 = vmatmul.mubr.msk.bf16.vlgmr.msra.gmra.mxu0 %vm918_vm3, %v1456_v20 }
 0x50e   : > { %2762 = vmatpush3.bf16.msra.mxu0 %v1577_v18  ;;  %2763 = vmatprep.mubr.msk.bf16.mxu0 %vm3032_vm2, %v3031_v22 }
 0x50f   : > { %2773 = vmatprep.subr.bf16.mxu0 %v3031_v22 }
 0x515   : > { %2764 = vmatmul.mubr.msk.bf16.vlgmr.msra.gmra.mxu0 %vm918_vm3, %v1570_v23 }
 0x516   : > { %2775 = vmatprep.mubr.msk.bf16.mxu0 %vm3032_vm2, %v3031_v22 }
 0x51f   : > { %v1687_v24 = vpop.xlane.xlu0 %1686 }
 0x520   : > { %2940 = vrcp.f32 %v1687_v24  ;;  %v2586_v24 = vld [vmem:[%s3640_s13] ss:$0 sm:$0xff] }
 0x523   : > { %v1692_v25 = vpop.permute.xlu0 %1691 }
 0x524   : > { %v1697_v26 = vsel %vm984_vm4, %v1692_v25, 0 }
 0x525   : > { %2774 = vmatpush3.bf16.msra.mxu0 %v1697_v26 }
 0x526   : > { %2785 = vmatprep.subr.bf16.mxu0 %v3031_v22 }
 0x52b   : > { %v1807_v27 = vpop.xlane.xlu1 %1806 }
 0x52c   : > { %2942 = vrcp.f32 %v1807_v27 }
 0x52d   : > { %v2941_v28 = vpop.eup %2940 }
 0x52e   : > { %v1689_v29 = vmul.f32 %v2941_v28, %v3404_v50 }
 0x52f   : > { %v1812_v30 = vpop.permute.xlu1 %1811 }
 0x530   : > { %v1817_v31 = vsel %vm984_vm4, %v1812_v30, 0  ;;  %v1690_v32 = vpack.c.bf16 %v1689_v29, %v1689_v29 }
 0x532   : > { %2776 = vmatmul.mubr.msk.bf16.vlgmr.msra.gmra.mxu0 %vm918_vm3, %v1690_v32 }
 0x533   : > { %2786 = vmatpush3.bf16.msra.mxu0 %v1817_v31  ;;  %2787 = vmatprep.mubr.msk.bf16.mxu0 %vm3032_vm2, %v3031_v22 }
 0x534   : > { %2799 = vmatprep.subr.bf16.mxu0 %v3031_v22 }
 0x539   : > { %v2943_v33 = vpop.eup %2942 }
 0x53a   : > { %v1809_v34 = vmul.f32 %v2943_v33, %v3408_v52 }
 0x53c   : > { %v1810_v35 = vpack.c.bf16 %v1809_v34, %v1809_v34 }
 0x53e   : > { %2788 = vmatmul.mubr.msk.bf16.vlgmr.msra.gmra.mxu0 %vm918_vm3, %v1810_v35 }
 0x53f   : > { %2803 = vmatprep.mubr.msk.bf16.mxu0 %vm3032_vm2, %v3031_v22 }
 0x589   : > { %v1022_v36 = vpop.f32.mrf.mxu0 }
 0x58a   : > { %v1028_v37 = vpack.c.bf16 %v1022_v36, %v1022_v36 }
 0x58b   : > { %v2705_v38 = vpop.f32.mrf.mxu0 }
 0x58c   : > { %1030 = vst.msk [vmem:[#allocation3] sm:$0xf] %vm1029_vm5, %v1028_v37 }
 0x58d   : > { %v1025_v39 = vpop.f32.mrf.mxu0 }
 0x58f   : > { %v2706_v40 = vpop.f32.mrf.mxu0 }
 0x591   : > { %v1137_v41 = vpop.f32.mrf.mxu0 }
 0x592   : > { %v2625_v42 = vpack.c.bf16 %v1137_v41, %v1137_v41 }
 0x593   : > { %v2717_v43 = vpop.f32.mrf.mxu0 }
 0x594   : > { %1147 = vrot.lane.b32.xlu0 %v2625_v42, %s3044_s26  ;;  %v2898_v43 = vld [vmem:[%s3216_s6 + $0x8] sm:$0xff]  }
 0x595   : > { %v1140_v44 = vpop.f32.mrf.mxu0  ;;  %2800 = vmatpush3.bf16.msra.mxu0 %v2898_v43 }
 0x596   : > { %v2899_v44 = vld [vmem:[%s3216_s6] sm:$0xff]   ;;  %2801 = vmatprep.subr.bf16.mxu0 %v3031_v22  ;;  %s3643_s6 = sld [smem:[#allocation20_spill]] (!%p2608_p11) }
 0x597   : > { %v2718_v45 = vpop.f32.mrf.mxu0 }
 0x599   : > { %2802 = vmatpush3.bf16.msra.mxu0 %v2899_v44 }
 0x5bd   : > { %v1258_v46 = vpop.f32.mrf.mxu0 }
 0x5be   : > { %v2626_v47 = vpack.c.bf16 %v1258_v46, %v1258_v46 }
 0x5bf   : > { %v2729_v50 = vpop.f32.mrf.mxu0 }
 0x5c0   : > { %1268 = vrot.lane.b32.xlu0 %v2626_v47, %s3045_s2 }
 0x5c1   : > { %v1261_v51 = vpop.f32.mrf.mxu0 }
 0x5c3   : > { %v2730_v52 = vpop.f32.mrf.mxu0 }
 0x5c5   : > { %v1379_v48 = vpop.f32.mrf.mxu0 }
 0x5c6   : > { %v2627_v53 = vpack.c.bf16 %v1379_v48, %v1379_v48 }
 0x5c7   : > { %v2741_v54 = vpop.f32.mrf.mxu0 }
 0x5c8   : > { %1389 = vrot.lane.b32.xlu0 %v2627_v53, %s3046_s8  ;;  %v2591_v54 = vld [vmem:[%s760_s17] ss:$0 sm:$0xff] }
 0x5c9   : > { %v1382_v55 = vpop.f32.mrf.mxu0 }
 0x5cb   : > { %v2742_v56 = vpop.f32.mrf.mxu0 }
 0x5cd   : > { %v1499_v57 = vpop.f32.mrf.mxu0 }
 0x5ce   : > { %v1505_v58 = vpack.c.bf16 %v1499_v57, %v1499_v57 }
 0x5cf   : > { %v2753_v59 = vpop.f32.mrf.mxu0 }
 0x5d0   : > { %1506 = vst.msk [vmem:[#allocation3 + $0x4] sm:$0xf] %vm1029_vm5, %v1505_v58  ;;  %v2592_v58 = vld [vmem:[%s763_s1] ss:$0 sm:$0xff]  ;;  %s3644_s1 = sld [smem:[#allocation21_spill]] (!%p2608_p11) }
 0x5d1   : > { %v1502_v60 = vpop.f32.mrf.mxu0 }
 0x5d3   : > { %v2754_v49 = vpop.f32.mrf.mxu0 }
 0x5d5   : > { %v1613_v61 = vpop.f32.mrf.mxu0 }
 0x5d6   : > { %v2628_v62 = vpack.c.bf16 %v1613_v61, %v1613_v61 }
 0x5d7   : > { %v2765_v63 = vpop.f32.mrf.mxu0 }
 0x5d8   : > { %1623 = vrot.lane.b32.xlu1 %v2628_v62, %s3044_s26  ;;  %v2900_v62 = vld [vmem:[%s3226_s28 + $0x38] sm:$0xff]   ;;  %v2901_v63 = vld [vmem:[%s3226_s28 + $0x30] sm:$0xff]  }
 0x5d9   : > { %v1616_v0 = vpop.f32.mrf.mxu0 }
 0x5da   : > { %v2902_v0 = vld [vmem:[%s3226_s28 + $0x28] sm:$0xff]  }
 0x5db   : > { %v2766_v1 = vpop.f32.mrf.mxu0 }
 0x5dc   : > { %v2903_v1 = vld [vmem:[%s3226_s28 + $0x20] sm:$0xff]  }
 0x5f2   : > { %v1733_v2 = vpop.f32.mrf.mxu0 }
 0x5f3   : > { %v2629_v3 = vpack.c.bf16 %v1733_v2, %v1733_v2  ;;  %v2904_v2 = vld [vmem:[%s3226_s28 + $0x18] sm:$0xff]  }
 0x5f4   : > { %v2777_v4 = vpop.f32.mrf.mxu0 }
 0x5f5   : > { %1743 = vrot.lane.b32.xlu1 %v2629_v3, %s3045_s2  ;;  %v2905_v3 = vld [vmem:[%s3226_s28 + $0x10] sm:$0xff]   ;;  %v2906_v4 = vld [vmem:[%s3226_s28 + $0x8] sm:$0xff]  }
 0x5f6   : > { %v1736_v6 = vpop.f32.mrf.mxu0 }
 0x5f7   : > { %v2593_v6 = vld [vmem:[%s771_s16] ss:$0 sm:$0xff] }
 0x5f8   : > { %v2778_v10 = vpop.f32.mrf.mxu0 }
 0x5fe   : > { %v1853_v11 = vpop.f32.mrf.mxu0 }
 0x5ff   : > { %v2630_v13 = vpack.c.bf16 %v1853_v11, %v1853_v11 }
 0x600   : > { %v2789_v14 = vpop.f32.mrf.mxu0 }
 0x601   : > { %1863 = vrot.lane.b32.xlu1 %v2630_v13, %s3046_s8 }
 0x602   : > { %v1856_v15 = vpop.f32.mrf.mxu0 }
 0x604   : > { %v2790_v12 = vpop.f32.mrf.mxu0 }
 0x606   : > { %v1148_v16 = vpop.permute.xlu0 %1147 }
 0x607   : > { %1151 = vst.msk [vmem:[#allocation3] sm:$0xf] %vm1150_vm6, %v1148_v16 }
 0x632   : > { %v1269_v19 = vpop.permute.xlu0 %1268 }
 0x633   : > { %1272 = vst.msk [vmem:[#allocation3] sm:$0xf] %vm1271_vm7, %v1269_v19 }
 0x63a   : > { %v1390_v20 = vpop.permute.xlu0 %1389 }
 0x63b   : > { %1393 = vst.msk [vmem:[#allocation3] sm:$0xf] %vm1392_vm8, %v1390_v20 }
 0x64a   : > { %v1624_v17 = vpop.permute.xlu1 %1623 }
 0x64b   : > { %1626 = vst.msk [vmem:[#allocation3 + $0x4] sm:$0xf] %vm1150_vm6, %v1624_v17 }
 0x667   : > { %v1744_v18 = vpop.permute.xlu1 %1743 }
 0x668   : > { %1746 = vst.msk [vmem:[#allocation3 + $0x4] sm:$0xf] %vm1271_vm7, %v1744_v18 }
 0x673   : > { %v1864_v21 = vpop.permute.xlu1 %1863 }
 0x674   : > { %1866 = vst.msk [vmem:[#allocation3 + $0x4] sm:$0xf] %vm1392_vm8, %v1864_v21 }
 0x67b   : > { %v2897_v23 = vld [vmem:[#allocation3] sm:$0xff]  }
 0x67c   : > { %2796 = vmatmul.mubr.msk.bf16.vlgmr.msra.gmra.mxu1 %vm802_vm1, %v2897_v23 }
 0x67d   : > { %2823 = vmatprep.mubr.msk.bf16.mxu1 %vm3032_vm2, %v3031_v22  ;;  %2808 = vmatpush3.bf16.msra.mxu1 %v2900_v62 }
 0x67e   : > { %2809 = vmatprep.subr.bf16.mxu1 %v3031_v22 }
 0x681   : > { %2810 = vmatpush3.bf16.msra.mxu1 %v2901_v63 }
 0x682   : > { %2811 = vmatprep.subr.bf16.mxu1 %v3031_v22 }
 0x685   : > { %2812 = vmatpush3.bf16.msra.mxu1 %v2902_v0 }
 0x686   : > { %2813 = vmatprep.subr.bf16.mxu1 %v3031_v22 }
 0x689   : > { %2814 = vmatpush3.bf16.msra.mxu1 %v2903_v1 }
 0x68a   : > { %2815 = vmatprep.subr.bf16.mxu1 %v3031_v22 }
 0x68d   : > { %2816 = vmatpush3.bf16.msra.mxu1 %v2904_v2 }
 0x68e   : > { %2817 = vmatprep.subr.bf16.mxu1 %v3031_v22 }
 0x691   : > { %2818 = vmatpush3.bf16.msra.mxu1 %v2905_v3 }
 0x692   : > { %2819 = vmatprep.subr.bf16.mxu1 %v3031_v22 }
 0x695   : > { %2820 = vmatpush3.bf16.msra.mxu1 %v2906_v4 }
 0x696   : > { %2821 = vmatprep.subr.bf16.mxu1 %v3031_v22 }
 0x699   : > { %2822 = vmatpush3.bf16.msra.mxu1 %v2907_v5 }
 0x73c   : > { %v1934_v25 = vpop.f32.mrf.mxu1 }
 0x73d   : > { %v1935_v26 = vadd.f32 %v2586_v24, %v1934_v25 }
 0x73e   : > { %v2797_v27 = vpop.f32.mrf.mxu1 }
 0x73f   : > { %v3476_v28 = vadd.f32 %v1935_v26, %v3239_v7 }
 0x740   : > { %v1937_v29 = vpop.f32.mrf.mxu1 }
 0x741   : > { %v1938_v30 = vadd.f32 %v2586_v24, %v1937_v29  ;;  %v1945_v31 = vsel %vm802_vm1, %v3476_v28, 0.0  ;;  %v2599_v29 = vld [vmem:[%s779_s20] ss:$0 sm:$0xff]  ;;  %s2194_s20 = scalar_lea.vmem (!%p2608_p11), [#allocation2], %s2193_s29 }
 0x742   : > { %1946 = vadd.xlane.f32.xlu0 %v1945_v31  ;;  %v2798_v32 = vpop.f32.mrf.mxu1 }
 0x743   : > { %v3481_v33 = vadd.f32 %v1938_v30, %v3241_v8 }
 0x745   : > { %v1948_v34 = vsel %vm802_vm1, %v3481_v33, 0.0 }
 0x746   : > { %1949 = vadd.xlane.f32.xlu1 %v1948_v34 }
 0x7cb   : > { %v1947_v35 = vpop.xlane.xlu0 %1946 }
 0x7cc   : > { %v1951_v36 = vmul.f32 0.03125, %v1947_v35 }
 0x7ce   : > { %v1953_v7 = vsub.f32 %v3476_v28, %v1951_v36 }
 0x7cf   : > { %v1950_v37 = vpop.xlane.xlu1 %1949 }
 0x7d0   : > { %v1952_v38 = vmul.f32 0.03125, %v1950_v37  ;;  %v1955_v39 = vmul.f32 %v1953_v7, %v1953_v7 }
 0x7d2   : > { %v1954_v40 = vsub.f32 %v3481_v33, %v1952_v38  ;;  %v1957_v41 = vsel %vm802_vm1, %v1955_v39, 0.0 }
 0x7d3   : > { %1958 = vadd.xlane.f32.xlu0 %v1957_v41 }
 0x7d4   : > { %v1956_v42 = vmul.f32 %v1954_v40, %v1954_v40 }
 0x7d6   : > { %v1960_v8 = vsel %vm802_vm1, %v1956_v42, 0.0 }
 0x7d7   : > { %1961 = vadd.xlane.f32.xlu0 %v1960_v8 }
 0x85c   : > { %v1959_v45 = vpop.xlane.xlu0 %1958 }
 0x85d   : > { %v1963_v46 = vmul.f32 0.03125, %v1959_v45 }
 0x85f   : > { %v1965_v47 = vadd.f32 1e-05, %v1963_v46 }
 0x860   : > { %v1962_v50 = vpop.xlane.xlu0 %1961 }
 0x861   : > { %2944 = vrsqrt.f32 %v1965_v47  ;;  %v1964_v51 = vmul.f32 0.03125, %v1962_v50 }
 0x863   : > { %v1966_v52 = vadd.f32 1e-05, %v1964_v51 }
 0x865   : > { %2946 = vrsqrt.f32 %v1966_v52 }
 0x86e   : > { %v2945_v48 = vpop.eup %2944 }
 0x86f   : > { %v1969_v53 = vmul.f32 %v2945_v48, %v1953_v7 }
 0x871   : > { %v1977_v57 = vmul.f32 %v2591_v54, %v1969_v53 }
 0x872   : > { %v2947_v55 = vpop.eup %2946 }
 0x873   : > { %v1970_v56 = vmul.f32 %v2947_v55, %v1954_v40  ;;  %v1985_v60 = vadd.f32 %v2592_v58, %v1977_v57 }
 0x875   : > { %v1978_v59 = vmul.f32 %v2591_v54, %v1970_v56 }
 0x877   : > { %v1986_v49 = vadd.f32 %v2592_v58, %v1978_v59 }
 0x879   : > { %v1987_v61 = vpack.c.bf16 %v1986_v49, %v1985_v60 }
 0x87b   : > { %2804 = vmatmul.mubr.msk.bf16.vlgmr.msra.gmra.mxu0 %vm802_vm1, %v1987_v61 }
 0x93b   : > { %v2048_v9 = vpop.f32.mrf.mxu0 }
 0x93c   : > { %v2049_v10 = vadd.f32 %v2593_v6, %v2048_v9 }
 0x93d   : > { %v2805_v11 = vpop.f32.mrf.mxu0 }
 0x93e   : > { %v2597_v13 = vmul.f32 -1.702, %v2049_v10 }
 0x93f   : > { %v2051_v14 = vpop.f32.mrf.mxu0 }
 0x940   : > { %v2059_v15 = vmul.f32 1.442695, %v2597_v13  ;;  %v2052_v12 = vadd.f32 %v2593_v6, %v2051_v14 }
 0x941   : > { %v2806_v16 = vpop.f32.mrf.mxu0 }
 0x942   : > { %2948 = vpow2.f32 %v2059_v15  ;;  %v2598_v19 = vmul.f32 -1.702, %v2052_v12 }
 0x944   : > { %v2061_v20 = vmul.f32 1.442695, %v2598_v19 }
 0x946   : > { %2950 = vpow2.f32 %v2061_v20 }
 0x94f   : > { %v2949_v22 = vpop.eup %2948 }
 0x950   : > { %v2063_v17 = vadd.f32 1.0, %v2949_v22 }
 0x952   : > { %2952 = vrcp.f32 %v2063_v17 }
 0x953   : > { %v2951_v18 = vpop.eup %2950 }
 0x954   : > { %v2064_v21 = vadd.f32 1.0, %v2951_v18 }
 0x956   : > { %2954 = vrcp.f32 %v2064_v21 }
 0x95f   : > { %v2953_v23 = vpop.eup %2952 }
 0x960   : > { %v2069_v25 = vmul.f32 %v2953_v23, %v2049_v10 }
 0x963   : > { %v2955_v24 = vpop.eup %2954 }
 0x964   : > { %v2070_v26 = vmul.f32 %v2955_v24, %v2052_v12 }
 0x966   : > { %v2071_v27 = vpack.c.bf16 %v2070_v26, %v2069_v25 }
 0x968   : > { %2824 = vmatmul.mubr.bf16.vlgmr.msra.gmra.mxu1 %v2071_v27 }
 0xa28   : > { %v2177_v30 = vpop.f32.mrf.mxu1 }
 0xa29   : > { %v2178_v31 = vadd.f32 %v2599_v29, %v2177_v30 }
 0xa2a   : > { %v2825_v32 = vpop.f32.mrf.mxu1 }
 0xa2b   : > { %v2184_v34 = vadd.f32 %v2178_v31, %v3476_v28 }
 0xa2c   : > { %v2180_v35 = vpop.f32.mrf.mxu1 }
 0xa2d   : > { %2186 = vst.msk [vmem:[#allocation2] sm:$0xff] %vm802_vm1, %v2184_v34  ;;  %v2181_v36 = vadd.f32 %v2599_v29, %v2180_v35  ;;  %2191 = sbr.rel (%p2608_p11) target bundleno = 3130 (0xc3a), region = 100 }
 0xa2e   : > { %v2826_v7 = vpop.f32.mrf.mxu1 }
 0xa2f   : > { %v2185_v37 = vadd.f32 %v2181_v36, %v3481_v33 }
 0xa31   : > { %2187 = vst.msk [vmem:[#allocation2 + $0x8] sm:$0xff] %vm802_vm1, %v2185_v37 }
 0xa32   : > { %vm2198_vm9 = vcmask 253952   ;;  %v2956_v51 = vld [vmem:[%s3642_s3 + $0x8] sm:$0xff]   ;;  %v3047_v48 = vmov 0.0   ;;  %v2957_v53 = vld [vmem:[%s3642_s3] sm:$0xff]   ;;  %vm3048_vm10 = vmmov 0  }
 0xa33   : > { %v2958_v52 = vld [vmem:[%s3642_s3 + $0x8] sm:$0xff]   ;;  %2827 = vmatprep.subr.bf16.mxu0 %v3047_v48  ;;  %2835 = vmatprep.subr.bf16.mxu1 %v3047_v48  ;;  %v2959_v54 = vld [vmem:[%s3642_s3] sm:$0xff]  }
 0xa34   : > { %2828 = vmatpush3.bf16.msra.mxu0 %v2956_v51  ;;  %2836 = vmatpush3.bf16.msra.mxu1 %v2958_v52  ;;  %v2196_v61 = vld [vmem:[%s3643_s6] sm:$0x1] }
 0xa35   : > { %2829 = vmatprep.subr.bf16.mxu0 %v3047_v48  ;;  %2831 = vmatprep.mubr.msk.bf16.mxu0 %vm3048_vm10, %v3047_v48  ;;  %v2197_v63 = vld [vmem:[%s3644_s1] sm:$0x1] }
 0xa36   : > { %2837 = vmatprep.subr.bf16.mxu1 %v3047_v48  ;;  %2839 = vmatprep.mubr.msk.bf16.mxu1 %vm3048_vm10, %v3047_v48  ;;  %v2280_v2 = vld [vmem:[%s3643_s6] sm:$0x1] }
 0xa37   : > { %v2281_v5 = vld [vmem:[%s3644_s1] sm:$0x1] }
 0xa38   : > { %v2195_v38 = vld [vmem:[%s2194_s20] sm:$0x1]  ;;  %v2613_v28 = vld [vmem:[%s2438_s21 + $0x8] sm:$0x1]  ;;  %2830 = vmatpush3.bf16.msra.mxu0 %v2957_v53  ;;  %2838 = vmatpush3.bf16.msra.mxu1 %v2959_v54 }
 0xa39   : > { %v2199_v39 = vsel %vm2198_vm9, %v2195_v38, 0.0  ;;  %v2282_v40 = vsel %vm2198_vm9, %v2613_v28, 0.0 }
 0xa3a   : > { %2200 = vadd.xlane.f32.xlu0 %v2199_v39 }
 0xa3e   : > { %2283 = vadd.xlane.f32.xlu0 %v2282_v40 }
 0xac3   : > { %v2201_v41 = vpop.xlane.xlu0 %2200 }
 0xac4   : > { %v2202_v33 = vmul.f32 0.03125, %v2201_v41 }
 0xac6   : > { %v2203_v42 = vsub.f32 %v2195_v38, %v2202_v33 }
 0xac7   : > { %v2284_v8 = vpop.xlane.xlu0 %2283 }
 0xac8   : > { %v2285_v43 = vmul.f32 0.03125, %v2284_v8  ;;  %v2204_v44 = vmul.f32 %v2203_v42, %v2203_v42 }
 0xaca   : > { %v2286_v45 = vsub.f32 %v2613_v28, %v2285_v43  ;;  %v2205_v46 = vsel %vm2198_vm9, %v2204_v44, 0.0 }
 0xacb   : > { %2206 = vadd.xlane.f32.xlu1 %v2205_v46 }
 0xacc   : > { %v2287_v47 = vmul.f32 %v2286_v45, %v2286_v45 }
 0xace   : > { %v2288_v50 = vsel %vm2198_vm9, %v2287_v47, 0.0 }
 0xacf   : > { %2289 = vadd.xlane.f32.xlu1 %v2288_v50 }
 0xb54   : > { %v2207_v55 = vpop.xlane.xlu1 %2206 }
 0xb55   : > { %v2208_v56 = vmul.f32 0.03125, %v2207_v55 }
 0xb57   : > { %v2209_v57 = vadd.f32 1e-05, %v2208_v56 }
 0xb58   : > { %v2290_v58 = vpop.xlane.xlu1 %2289 }
 0xb59   : > { %2960 = vrsqrt.f32 %v2209_v57  ;;  %v2291_v59 = vmul.f32 0.03125, %v2290_v58 }
 0xb5b   : > { %v2292_v60 = vadd.f32 1e-05, %v2291_v59 }
 0xb5d   : > { %2962 = vrsqrt.f32 %v2292_v60 }
 0xb66   : > { %v2961_v49 = vpop.eup %2960 }
 0xb67   : > { %v2211_v62 = vmul.f32 %v2961_v49, %v2203_v42 }
 0xb69   : > { %v2212_v0 = vmul.f32 %v2211_v62, %v2196_v61 }
 0xb6a   : > { %v2963_v1 = vpop.eup %2962 }
 0xb6b   : > { %v2213_v3 = vadd.f32 %v2212_v0, %v2197_v63  ;;  %v2294_v4 = vmul.f32 %v2963_v1, %v2286_v45 }
 0xb6d   : > { %v2214_v6 = vpack.c.bf16 %v2213_v3, %v2213_v3  ;;  %v2295_v9 = vmul.f32 %v2294_v4, %v2280_v2 }
 0xb6f   : > { %2832 = vmatmul.mubr.msk.bf16.vlgmr.msra.gmra.mxu0 %vm802_vm1, %v2214_v6  ;;  %v2296_v10 = vadd.f32 %v2295_v9, %v2281_v5 }
 0xb71   : > { %v2297_v11 = vpack.c.bf16 %v2296_v10, %v2296_v10 }
 0xb73   : > { %2840 = vmatmul.mubr.msk.bf16.vlgmr.msra.gmra.mxu1 %vm802_vm1, %v2297_v11 }
 0xc2f   : > { %v2268_v13 = vpop.f32.mrf.mxu0 }
 0xc30   : > { %2274 = vst.msk [vmem:[#allocation6] sm:$0x1] %vm2198_vm9, %v2268_v13 }
 0xc31   : > { %v2833_v14 = vpop.f32.mrf.mxu0 }
 0xc33   : > { %v2271_v15 = vpop.f32.mrf.mxu0  ;;  %v2351_v12 = vpop.f32.mrf.mxu1 }
 0xc34   : > { %2357 = vst.msk [vmem:[#allocation6 + $0x1] sm:$0x1] %vm2198_vm9, %v2351_v12 }
 0xc35   : > { %v2834_v16 = vpop.f32.mrf.mxu0  ;;  %v2841_v19 = vpop.f32.mrf.mxu1 }
 0xc37   : > { %v2354_v20 = vpop.f32.mrf.mxu1 }
 0xc39   : > { %v2842_v22 = vpop.f32.mrf.mxu1 }
 0xc3a PF: > { %s3645_s25 = sld [smem:[#allocation11_spill]]  ;;  %s3049_s22 = smov [#allocation6]  }
 0xc3b   : > { %s2367_s30 = sshll.u32 %s3049_s22, 4  ;;  %s2368_s30 = int_to_ptr.vmem [resolvable:$true] %s2367_s30 }
 0xc3c   : > { %s2976_s26 = scalar_lea.vmem %s2368_s30, 32  ;;  %p2983_p2 = scmp.lt.s32.totalorder %s2368_s30, %s2368_s30 }
 0xc3d   : > { %p2977_p13 = scmp.ne.s32.totalorder %s2368_s30, %s2976_s26  ;;  %p2984_p3 = scmp.lt.s32.totalorder %s2976_s26, %s2976_s26 }
 0xc3f   : > { %p2985_p4 = por %p2984_p3, %p2983_p2 }
 0xc40   : > { %s3646_s20 = sadd.s32 4294967295, %s3645_s25  }
 0xc41   : > { %p3567_p12 = scmp.eq.s32.totalorder %s3646_s20, 1 }
 0xc43   : > { %p2978_p0 = pnand %p2977_p13, %p3567_p12 }
 0xc45   : > { %p2979_p1 = pneg %p2978_p0 }
 0xc47   : > { %p2986_p5 = pnand %p2985_p4, %p2979_p1 }
 0xc49   : > { %2989 = shalt.err (!%p2986_p5)
}
 0xc4a   : > { %s3648_s19 = sld [smem:[#allocation23_spill]] }
 0xc50   : > { %2844 = dma.vmem_to_hbm [thread:$0]  (%p3567_p12), %s2368_s30, 32, %s3648_s19, [#allocation7]  }
 0xc51   : > { %3015 = dma.done.wait (%p3567_p12), [#allocation7], 32  }
 0xc52   : > { %3017 = vsyncadd (%p3567_p12), [#allocation7], 4294967264 }
 0xc53 PF: > { %s3649_s18 = sld [smem:[#allocation11_spill]] }
 0xc54   : > { %s3650_s22 = sld [smem:[#allocation10_spill]] }
 0xc55   : > { %s3651_s2 = sld [smem:[#allocation12_spill]] }
 0xc59   : > { %s36_s23 = sadd.s32 1, %s3649_s18  }
 0xc5a   : > { %p33_p6 = scmp.ge.s32.totalorder %s36_s23, 4  }
 0xc5c   :  { %35 = sbr.rel (!%p33_p6) target bundleno = 34 (0x22), region = 167 }
 0xc61   :  { %2380 = vsyncpa [#allocation7], 1 }
 0xc62   :  { %2382 = vsyncpa [#allocation7 + $0x1], 1 }

</bundles_post_ra>
